<compile_context>
chip_gen: v7x
topology: tpu7x:2x2x1
jax: 0.10.0
libtpu: 0.0.40
codegen_flags: <defaults>
</compile_context>

<pallas_src>
import functools

import jax
import jax.numpy as jnp
from jax import lax
from jax.experimental import pallas as pl
from jax.experimental.pallas import tpu as pltpu

_LANE = 128
_EPS = 1e-5


def _round_up(x, m):
    return (x + m - 1) // m * m


def _pick_row_tile(h):
    # Largest small power of two that divides the (stride-1) output height.
    for cand in (8, 4, 2, 1):
        if h % cand == 0:
            return cand
    return 1


# ----------------------------------------------------------------------------
# Fused Pallas kernel: one (batch, row-tile) step of the whole block.
# ----------------------------------------------------------------------------
def _fused_block_kernel(x_ref, we_ref, be_ref, wd_ref, bd_ref, wp_ref, bp_ref,
                        o_ref, hid_ref, *, th, h_in, w_in, expand, use_res):
    """
    x_ref  : (1, Hp, Wpad, Cinp) f32   zero-padded input image (halo + lane pad)
    we_ref : (Cinp, Chp)         bf16  1x1 expand weight (BN scale folded)
    be_ref : (1, Chp)            f32   expand BN bias
    wd_ref : (9, Chp)            f32   3x3 depthwise weight (BN scale folded)
    bd_ref : (1, Chp)            f32   depthwise BN bias
    wp_ref : (Chp, Coutp)        bf16  1x1 projection weight (BN scale folded)
    bp_ref : (1, Coutp)          f32   projection BN bias
    o_ref  : (1, TH, W, Coutp)   f32   output row tile
    hid_ref: (TH+2, Wpad, Chp)   f32   VMEM scratch: padded hidden activation
    """
    wpad = x_ref.shape[2]
    cinp = x_ref.shape[3]
    chp = hid_ref.shape[2]
    coutp = o_ref.shape[3]
    win_h = th + 2

    t = pl.program_id(1)
    p0 = pl.multiple_of(t * th, th)            # first padded input row of tile

    xwin = x_ref[0, pl.ds(p0, win_h), :, :]    # (win_h, wpad, cinp) f32

    # ---- 1x1 expand + BN + ReLU6 (skipped when expand_ratio == 1) ----------
    if expand:
        xe = xwin.reshape(win_h * wpad, cinp).astype(jnp.bfloat16)
        hexp = jnp.dot(xe, we_ref[...], preferred_element_type=jnp.float32)
        hexp = jnp.clip(hexp + be_ref[...], 0.0, 6.0)
        hid = hexp.reshape(win_h, wpad, chp)
    else:
        hid = xwin

    # The depthwise conv needs TRUE zero spatial padding of the hidden
    # activation (expand(0) != 0 because of the BN bias): zero every column
    # outside [1, w_in], then park the tile's hidden activation in VMEM.
    cols = lax.broadcasted_iota(jnp.int32, (1, wpad, 1), 1)
    col_ok = (cols >= 1) & (cols <= w_in)
    hid_ref[...] = jnp.where(col_ok, hid, 0.0)

    # Zero the top / bottom halo row (only present in the first / last tile).
    @pl.when(t == 0)
    def _zero_top():
        hid_ref[0, :, :] = jnp.zeros((wpad, chp), jnp.float32)

    @pl.when(t == pl.num_programs(1) - 1)
    def _zero_bottom():
        hid_ref[win_h - 1, :, :] = jnp.zeros((wpad, chp), jnp.float32)

    # ---- 3x3 depthwise (stride 1) + BN + ReLU6 ------------------------------
    wd = wd_ref[...]                                          # (9, chp)
    acc = jnp.zeros((th, w_in, chp), jnp.float32)
    for kh in range(3):
        for kw in range(3):
            win = hid_ref[kh:kh + th, kw:kw + w_in, :]        # unit-stride taps
            acc = acc + win * wd[3 * kh + kw:3 * kh + kw + 1, :]
    acc = jnp.clip(acc + bd_ref[...], 0.0, 6.0)

    # ---- 1x1 projection + BN (+ residual) -----------------------------------
    a2 = acc.reshape(th * w_in, chp).astype(jnp.bfloat16)
    y = jnp.dot(a2, wp_ref[...], preferred_element_type=jnp.float32)
    y = y + bp_ref[...]
    if use_res:
        # Residual read straight from the resident padded-input block.
        res = x_ref[0, pl.ds(p0 + 1, th), pl.ds(1, w_in), :]  # (th, w_in, cinp)
        y = y + res.reshape(th * w_in, coutp)                 # cinp == coutp here
    o_ref[0] = y.reshape(th, w_in, coutp)


# ----------------------------------------------------------------------------
# BN folding helpers (plain JAX glue)
# ----------------------------------------------------------------------------
def _bn_fold(bn):
    scale = bn["gamma"] / jnp.sqrt(bn["var"] + _EPS)
    shift = bn["beta"] - bn["mean"] * scale
    return scale, shift


def init_params(key, inp, oup, expand_ratio):
    hidden = int(round(inp * expand_ratio))
    keys = jax.random.split(key, 6)

    def bn_init(k, c):
        k1, k2, k3, k4 = jax.random.split(k, 4)
        return dict(
            gamma=jax.random.uniform(k1, (c,), jnp.float32, 0.5, 1.5),
            beta=0.1 * jax.random.normal(k2, (c,), jnp.float32),
            mean=0.1 * jax.random.normal(k3, (c,), jnp.float32),
            var=jax.random.uniform(k4, (c,), jnp.float32, 0.5, 1.5),
        )

    params = {}
    if expand_ratio != 1:
        params["w_expand"] = 0.1 * jax.random.normal(keys[0], (inp, hidden), jnp.float32)
        params["bn_expand"] = bn_init(keys[1], hidden)
    params["w_dw"] = 0.1 * jax.random.normal(keys[2], (3, 3, hidden), jnp.float32)
    params["bn_dw"] = bn_init(keys[3], hidden)
    params["w_proj"] = 0.1 * jax.random.normal(keys[4], (hidden, oup), jnp.float32)
    params["bn_proj"] = bn_init(keys[5], oup)
    return params


# ----------------------------------------------------------------------------
# Forward pass (Pallas) and pure-JAX reference
# ----------------------------------------------------------------------------
def inverted_residual_forward(x_nchw, params, *, inp, oup, stride, expand_ratio):
    assert stride in (1, 2)
    n, cin, h, w = x_nchw.shape
    assert cin == inp
    hidden = int(round(inp * expand_ratio))
    expand = expand_ratio != 1
    use_res = (stride == 1) and (inp == oup)

    cinp = _round_up(cin, _LANE)
    chp = _round_up(hidden, _LANE)
    coutp = _round_up(oup, _LANE)
    hp = h + 2                               # halo-padded height
    wpad = _round_up(w + 2, 8)               # halo-padded width, sublane aligned

    # NCHW -> NHWC; halo + sublane-alignment + channel-lane padding in ONE
    # cheap pass over the narrow (un-expanded) input.
    x = jnp.transpose(x_nchw, (0, 2, 3, 1))
    x_pad = jnp.pad(x, ((0, 0), (1, 1), (1, wpad - w - 1), (0, cinp - cin)))

    # Fold BN (inference) into conv scale + bias; lane-pad; bf16 matmul weights.
    if expand:
        s, b = _bn_fold(params["bn_expand"])
        we = jnp.pad(params["w_expand"] * s[None, :],
                     ((0, cinp - cin), (0, chp - hidden))).astype(jnp.bfloat16)
        be = jnp.pad(b, (0, chp - hidden)).reshape(1, chp).astype(jnp.float32)
    else:
        assert hidden == cin and chp == cinp
        we = jnp.zeros((cinp, chp), jnp.bfloat16)     # placeholders (unused)
        be = jnp.zeros((1, chp), jnp.float32)

    s, b = _bn_fold(params["bn_dw"])
    wd = jnp.pad((params["w_dw"] * s[None, None, :]).reshape(9, hidden),
                 ((0, 0), (0, chp - hidden))).astype(jnp.float32)
    bd = jnp.pad(b, (0, chp - hidden)).reshape(1, chp).astype(jnp.float32)

    s, b = _bn_fold(params["bn_proj"])
    wpj = jnp.pad(params["w_proj"] * s[None, :],
                  ((0, chp - hidden), (0, coutp - oup))).astype(jnp.bfloat16)
    bp = jnp.pad(b, (0, coutp - oup)).reshape(1, coutp).astype(jnp.float32)

    th = _pick_row_tile(h)
    n_tiles = h // th
    win_h = th + 2

    kernel = functools.partial(_fused_block_kernel, th=th, h_in=h, w_in=w,
                               expand=expand, use_res=use_res)

    out = pl.pallas_call(
        kernel,
        out_shape=jax.ShapeDtypeStruct((n, h, w, coutp), jnp.float32),
        grid=(n, n_tiles),
        in_specs=[
            pl.BlockSpec((1, hp, wpad, cinp), lambda bi, ti: (bi, 0, 0, 0)),
            pl.BlockSpec((cinp, chp), lambda bi, ti: (0, 0)),
            pl.BlockSpec((1, chp), lambda bi, ti: (0, 0)),
            pl.BlockSpec((9, chp), lambda bi, ti: (0, 0)),
            pl.BlockSpec((1, chp), lambda bi, ti: (0, 0)),
            pl.BlockSpec((chp, coutp), lambda bi, ti: (0, 0)),
            pl.BlockSpec((1, coutp), lambda bi, ti: (0, 0)),
        ],
        out_specs=pl.BlockSpec((1, th, w, coutp), lambda bi, ti: (bi, ti, 0, 0)),
        scratch_shapes=[pltpu.VMEM((win_h, wpad, chp), jnp.float32)],
        compiler_params=pltpu.CompilerParams(
            dimension_semantics=("parallel", "parallel"),
            # Tiles are sized for <=32 MiB scoped VMEM, safe on v5e/v6e/v7x.
            vmem_limit_bytes=32 * 1024 * 1024),
    )(x_pad, we, be, wd, bd, wpj, bp)

    if stride == 2:
        # 3x3 / pad 1 / stride 2 == the stride-1 result sampled every 2 rows/cols.
        out = out[:, ::2, ::2, :]

    out = out[:, :, :, :oup]                 # drop lane padding
    return jnp.transpose(out, (0, 3, 1, 2))  # NHWC -> NCHW


def reference_forward(x_nchw, params, *, inp, oup, stride, expand_ratio):
    use_res = (stride == 1) and (inp == oup)
    x = jnp.transpose(x_nchw, (0, 2, 3, 1))

    def bn(z, p):
        s, sh = _bn_fold(p)
        return z * s + sh

    h = x
    if expand_ratio != 1:
        h = jnp.clip(bn(jnp.einsum("nhwc,cd->nhwd", h, params["w_expand"]),
                        params["bn_expand"]), 0.0, 6.0)
    c = h.shape[-1]
    dw = lax.conv_general_dilated(
        h, params["w_dw"][:, :, None, :], window_strides=(stride, stride),
        padding=((1, 1), (1, 1)), feature_group_count=c,
        dimension_numbers=("NHWC", "HWIO", "NHWC"))
    h = jnp.clip(bn(dw, params["bn_dw"]), 0.0, 6.0)
    h = bn(jnp.einsum("nhwc,cd->nhwd", h, params["w_proj"]), params["bn_proj"])
    if use_res:
        h = h + x
    return jnp.transpose(h, (0, 3, 1, 2))


# ----------------------------------------------------------------------------
if __name__ == "__main__":
    key = jax.random.PRNGKey(0)
    N, H, W = 2, 16, 16

    configs = [
        dict(inp=4, oup=4, stride=1, expand_ratio=6),   # residual path (primary)
        dict(inp=8, oup=8, stride=1, expand_ratio=1),   # no expand conv
        dict(inp=4, oup=8, stride=2, expand_ratio=6),   # strided, no residual
    ]

    for cfg in configs:
        key, kx, kp = jax.random.split(key, 3)
        x = jax.random.normal(kx, (N, cfg["inp"], H, W), jnp.float32)
        params = init_params(kp, cfg["inp"], cfg["oup"], cfg["expand_ratio"])

        y = inverted_residual_forward(x, params, **cfg)
        y = jax.block_until_ready(y)

        y_ref = reference_forward(x, params, **cfg)
        hout = (H + 2 - 3) // cfg["stride"] + 1
        wout = (W + 2 - 3) // cfg["stride"] + 1
        assert y.shape == (N, cfg["oup"], hout, wout), (y.shape, cfg)
        # Tolerance covers bf16 MXU operands (f32 accumulation) vs f32 reference.
        assert jnp.allclose(y, y_ref, atol=5e-2, rtol=5e-2), f"mismatch for {cfg}"

    print("KERNEL_OK")
</pallas_src>

<mosaic_0001>
module attributes {stable_mosaic.version = 11 : i64} {
  func.func @_fused_block_kernel(%arg0: i32, %arg1: i32, %arg2: memref<1x18x24x128xf32, #tpu.memory_space<vmem>>, %arg3: memref<128x128xbf16, #tpu.memory_space<vmem>>, %arg4: memref<1x128xf32, #tpu.memory_space<vmem>>, %arg5: memref<9x128xf32, #tpu.memory_space<vmem>>, %arg6: memref<1x128xf32, #tpu.memory_space<vmem>>, %arg7: memref<128x128xbf16, #tpu.memory_space<vmem>>, %arg8: memref<1x128xf32, #tpu.memory_space<vmem>>, %arg9: memref<1x8x16x128xf32, #tpu.memory_space<vmem>>, %arg10: memref<10x24x128xf32, #tpu.memory_space<vmem>>) attributes {dimension_semantics = [#tpu.dimension_semantics<parallel>, #tpu.dimension_semantics<parallel>], iteration_bounds = array<i64: 2, 2>, scalar_prefetch = 0 : i64, scratch_operands = 1 : i64, tpu.core_type = #tpu.core_type<tc>, window_params = [{transform_indices = @transform_0, window_bounds = array<i64: 1, 18, 24, 128>}, {pipeline_mode = #tpu.pipeline_mode<synchronous>, transform_indices = @transform_1, window_bounds = array<i64: 128, 128>}, {pipeline_mode = #tpu.pipeline_mode<synchronous>, transform_indices = @transform_2, window_bounds = array<i64: 1, 128>}, {pipeline_mode = #tpu.pipeline_mode<synchronous>, transform_indices = @transform_3, window_bounds = array<i64: 9, 128>}, {pipeline_mode = #tpu.pipeline_mode<synchronous>, transform_indices = @transform_4, window_bounds = array<i64: 1, 128>}, {pipeline_mode = #tpu.pipeline_mode<synchronous>, transform_indices = @transform_5, window_bounds = array<i64: 128, 128>}, {pipeline_mode = #tpu.pipeline_mode<synchronous>, transform_indices = @transform_6, window_bounds = array<i64: 1, 128>}, {transform_indices = @transform_7, window_bounds = array<i64: 1, 8, 16, 128>}]} {
    %c8_i32 = arith.constant 8 : i32
    %0 = arith.muli %arg1, %c8_i32 : i32
    %1 = tpu.assume_multiple %0, 8 : i32
    %c0 = arith.constant 0 : index
    %2 = arith.index_cast %1 : i32 to index
    %c0_0 = arith.constant 0 : index
    %c0_1 = arith.constant 0 : index
    %3 = vector.load %arg2[%c0, %2, %c0_0, %c0_1] : memref<1x18x24x128xf32, #tpu.memory_space<vmem>>, vector<1x10x24x128xf32>
    %4 = vector.shape_cast %3 : vector<1x10x24x128xf32> to vector<10x24x128xf32>
    %5 = vector.shape_cast %4 : vector<10x24x128xf32> to vector<240x128xf32>
    %6 = arith.truncf %5 : vector<240x128xf32> to vector<240x128xbf16>
    %c0_2 = arith.constant 0 : index
    %c0_3 = arith.constant 0 : index
    %7 = vector.load %arg3[%c0_2, %c0_3] : memref<128x128xbf16, #tpu.memory_space<vmem>>, vector<128x128xbf16>
    %cst = arith.constant dense<0.000000e+00> : vector<240x128xf32>
    %8 = tpu.matmul %6, %7, %cst {dimension_numbers = #tpu.dot_dimension_numbers<[1], [0], [0], [1], [0, 0, 1, 1], [], []>} : vector<240x128xbf16>, vector<128x128xbf16>, vector<240x128xf32> -> vector<240x128xf32>
    %c0_4 = arith.constant 0 : index
    %c0_5 = arith.constant 0 : index
    %9 = vector.load %arg4[%c0_4, %c0_5] : memref<1x128xf32, #tpu.memory_space<vmem>>, vector<1x128xf32>
    %10 = vector.broadcast %9 : vector<1x128xf32> to vector<240x128xf32>
    %11 = arith.addf %8, %10 : vector<240x128xf32>
    %cst_6 = arith.constant 0.000000e+00 : f32
    %cst_7 = arith.constant 6.000000e+00 : f32
    %12 = vector.broadcast %cst_6 : f32 to vector<240x128xf32>
    %13 = arith.maximumf %12, %11 : vector<240x128xf32>
    %14 = vector.broadcast %cst_7 : f32 to vector<240x128xf32>
    %15 = arith.minimumf %14, %13 : vector<240x128xf32>
    %16 = vector.shape_cast %15 : vector<240x128xf32> to vector<10x24x128xf32>
    %17 = tpu.iota {dimensions = array<i32: 1>} : vector<1x24x1xi32>
    %c1_i32 = arith.constant 1 : i32
    %18 = vector.broadcast %c1_i32 : i32 to vector<1x24x1xi32>
    %19 = arith.cmpi sge, %17, %18 : vector<1x24x1xi32>
    %c16_i32 = arith.constant 16 : i32
    %20 = vector.broadcast %c16_i32 : i32 to vector<1x24x1xi32>
    %21 = arith.cmpi sle, %17, %20 : vector<1x24x1xi32>
    %22 = arith.andi %19, %21 : vector<1x24x1xi1>
    %cst_8 = arith.constant 0.000000e+00 : f32
    %23 = vector.shape_cast %22 : vector<1x24x1xi1> to vector<1x24x1xi1>
    %24 = vector.broadcast %23 : vector<1x24x1xi1> to vector<10x24x128xi1>
    %25 = vector.broadcast %cst_8 : f32 to vector<10x24x128xf32>
    %26 = arith.select %24, %16, %25 : vector<10x24x128xi1>, vector<10x24x128xf32>
    %c0_9 = arith.constant 0 : index
    %c0_10 = arith.constant 0 : index
    %c0_11 = arith.constant 0 : index
    %27 = vector.load %arg10[%c0_9, %c0_10, %c0_11] : memref<10x24x128xf32, #tpu.memory_space<vmem>>, vector<10x24x128xf32>
    tpu.vector_store %arg10[%c0_9, %c0_10, %c0_11], %26 {strides = array<i32>} : memref<10x24x128xf32, #tpu.memory_space<vmem>>, vector<10x24x128xf32>,
    %c0_i32 = arith.constant 0 : i32
    %28 = arith.cmpi eq, %arg1, %c0_i32 : i32
    %29 = arith.extui %28 : i1 to i32
    %c0_i32_12 = arith.constant 0 : i32
    %30 = arith.cmpi ne, %29, %c0_i32_12 : i32
    scf.if %30 {
      %cst_60 = arith.constant 0.000000e+00 : f32
      %115 = vector.broadcast %cst_60 : f32 to vector<24x128xf32>
      %c0_61 = arith.constant 0 : index
      %c0_62 = arith.constant 0 : index
      %c0_63 = arith.constant 0 : index
      %116 = vector.load %arg10[%c0_61, %c0_62, %c0_63] : memref<10x24x128xf32, #tpu.memory_space<vmem>>, vector<1x24x128xf32>
      %117 = vector.shape_cast %116 : vector<1x24x128xf32> to vector<24x128xf32>
      %118 = vector.shape_cast %115 : vector<24x128xf32> to vector<1x24x128xf32>
      tpu.vector_store %arg10[%c0_61, %c0_62, %c0_63], %118 {strides = array<i32>} : memref<10x24x128xf32, #tpu.memory_space<vmem>>, vector<1x24x128xf32>,
    } else {
    }
    %c1_i32_13 = arith.constant 1 : i32
    %31 = arith.cmpi eq, %arg1, %c1_i32_13 : i32
    %32 = arith.extui %31 : i1 to i32
    %c0_i32_14 = arith.constant 0 : i32
    %33 = arith.cmpi ne, %32, %c0_i32_14 : i32
    scf.if %33 {
      %cst_60 = arith.constant 0.000000e+00 : f32
      %115 = vector.broadcast %cst_60 : f32 to vector<24x128xf32>
      %c9 = arith.constant 9 : index
      %c0_61 = arith.constant 0 : index
      %c0_62 = arith.constant 0 : index
      %116 = vector.load %arg10[%c9, %c0_61, %c0_62] : memref<10x24x128xf32, #tpu.memory_space<vmem>>, vector<1x24x128xf32>
      %117 = vector.shape_cast %116 : vector<1x24x128xf32> to vector<24x128xf32>
      %118 = vector.shape_cast %115 : vector<24x128xf32> to vector<1x24x128xf32>
      tpu.vector_store %arg10[%c9, %c0_61, %c0_62], %118 {strides = array<i32>} : memref<10x24x128xf32, #tpu.memory_space<vmem>>, vector<1x24x128xf32>,
    } else {
    }
    %c0_15 = arith.constant 0 : index
    %c0_16 = arith.constant 0 : index
    %34 = vector.load %arg5[%c0_15, %c0_16] : memref<9x128xf32, #tpu.memory_space<vmem>>, vector<9x128xf32>
    %cst_17 = arith.constant 0.000000e+00 : f32
    %35 = vector.broadcast %cst_17 : f32 to vector<8x16x128xf32>
    %c0_18 = arith.constant 0 : index
    %c0_19 = arith.constant 0 : index
    %c0_20 = arith.constant 0 : index
    %36 = vector.load %arg10[%c0_18, %c0_19, %c0_20] : memref<10x24x128xf32, #tpu.memory_space<vmem>>, vector<8x16x128xf32>
    %37 = vector.extract_strided_slice %34 {offsets = [0, 0], sizes = [1, 128], strides = [1, 1]} : vector<9x128xf32> to vector<1x128xf32>
    %38 = vector.shape_cast %37 : vector<1x128xf32> to vector<1x1x128xf32>
    %39 = vector.broadcast %38 : vector<1x1x128xf32> to vector<8x16x128xf32>
    %40 = arith.mulf %36, %39 : vector<8x16x128xf32>
    %41 = arith.addf %35, %40 : vector<8x16x128xf32>
    %c0_21 = arith.constant 0 : index
    %c1 = arith.constant 1 : index
    %c0_22 = arith.constant 0 : index
    %42 = vector.load %arg10[%c0_21, %c1, %c0_22] : memref<10x24x128xf32, #tpu.memory_space<vmem>>, vector<8x16x128xf32>
    %43 = vector.extract_strided_slice %34 {offsets = [1, 0], sizes = [1, 128], strides = [1, 1]} : vector<9x128xf32> to vector<1x128xf32>
    %44 = vector.shape_cast %43 : vector<1x128xf32> to vector<1x1x128xf32>
    %45 = vector.broadcast %44 : vector<1x1x128xf32> to vector<8x16x128xf32>
    %46 = arith.mulf %42, %45 : vector<8x16x128xf32>
    %47 = arith.addf %41, %46 : vector<8x16x128xf32>
    %c0_23 = arith.constant 0 : index
    %c2 = arith.constant 2 : index
    %c0_24 = arith.constant 0 : index
    %48 = vector.load %arg10[%c0_23, %c2, %c0_24] : memref<10x24x128xf32, #tpu.memory_space<vmem>>, vector<8x16x128xf32>
    %49 = vector.extract_strided_slice %34 {offsets = [2, 0], sizes = [1, 128], strides = [1, 1]} : vector<9x128xf32> to vector<1x128xf32>
    %50 = vector.shape_cast %49 : vector<1x128xf32> to vector<1x1x128xf32>
    %51 = vector.broadcast %50 : vector<1x1x128xf32> to vector<8x16x128xf32>
    %52 = arith.mulf %48, %51 : vector<8x16x128xf32>
    %53 = arith.addf %47, %52 : vector<8x16x128xf32>
    %c1_25 = arith.constant 1 : index
    %c0_26 = arith.constant 0 : index
    %c0_27 = arith.constant 0 : index
    %54 = vector.load %arg10[%c1_25, %c0_26, %c0_27] : memref<10x24x128xf32, #tpu.memory_space<vmem>>, vector<8x16x128xf32>
    %55 = vector.extract_strided_slice %34 {offsets = [3, 0], sizes = [1, 128], strides = [1, 1]} : vector<9x128xf32> to vector<1x128xf32>
    %56 = vector.shape_cast %55 : vector<1x128xf32> to vector<1x1x128xf32>
    %57 = vector.broadcast %56 : vector<1x1x128xf32> to vector<8x16x128xf32>
    %58 = arith.mulf %54, %57 : vector<8x16x128xf32>
    %59 = arith.addf %53, %58 : vector<8x16x128xf32>
    %c1_28 = arith.constant 1 : index
    %c1_29 = arith.constant 1 : index
    %c0_30 = arith.constant 0 : index
    %60 = vector.load %arg10[%c1_28, %c1_29, %c0_30] : memref<10x24x128xf32, #tpu.memory_space<vmem>>, vector<8x16x128xf32>
    %61 = vector.extract_strided_slice %34 {offsets = [4, 0], sizes = [1, 128], strides = [1, 1]} : vector<9x128xf32> to vector<1x128xf32>
    %62 = vector.shape_cast %61 : vector<1x128xf32> to vector<1x1x128xf32>
    %63 = vector.broadcast %62 : vector<1x1x128xf32> to vector<8x16x128xf32>
    %64 = arith.mulf %60, %63 : vector<8x16x128xf32>
    %65 = arith.addf %59, %64 : vector<8x16x128xf32>
    %c1_31 = arith.constant 1 : index
    %c2_32 = arith.constant 2 : index
    %c0_33 = arith.constant 0 : index
    %66 = vector.load %arg10[%c1_31, %c2_32, %c0_33] : memref<10x24x128xf32, #tpu.memory_space<vmem>>, vector<8x16x128xf32>
    %67 = vector.extract_strided_slice %34 {offsets = [5, 0], sizes = [1, 128], strides = [1, 1]} : vector<9x128xf32> to vector<1x128xf32>
    %68 = vector.shape_cast %67 : vector<1x128xf32> to vector<1x1x128xf32>
    %69 = vector.broadcast %68 : vector<1x1x128xf32> to vector<8x16x128xf32>
    %70 = arith.mulf %66, %69 : vector<8x16x128xf32>
    %71 = arith.addf %65, %70 : vector<8x16x128xf32>
    %c2_34 = arith.constant 2 : index
    %c0_35 = arith.constant 0 : index
    %c0_36 = arith.constant 0 : index
    %72 = vector.load %arg10[%c2_34, %c0_35, %c0_36] : memref<10x24x128xf32, #tpu.memory_space<vmem>>, vector<8x16x128xf32>
    %73 = vector.extract_strided_slice %34 {offsets = [6, 0], sizes = [1, 128], strides = [1, 1]} : vector<9x128xf32> to vector<1x128xf32>
    %74 = vector.shape_cast %73 : vector<1x128xf32> to vector<1x1x128xf32>
    %75 = vector.broadcast %74 : vector<1x1x128xf32> to vector<8x16x128xf32>
    %76 = arith.mulf %72, %75 : vector<8x16x128xf32>
    %77 = arith.addf %71, %76 : vector<8x16x128xf32>
    %c2_37 = arith.constant 2 : index
    %c1_38 = arith.constant 1 : index
    %c0_39 = arith.constant 0 : index
    %78 = vector.load %arg10[%c2_37, %c1_38, %c0_39] : memref<10x24x128xf32, #tpu.memory_space<vmem>>, vector<8x16x128xf32>
    %79 = vector.extract_strided_slice %34 {offsets = [7, 0], sizes = [1, 128], strides = [1, 1]} : vector<9x128xf32> to vector<1x128xf32>
    %80 = vector.shape_cast %79 : vector<1x128xf32> to vector<1x1x128xf32>
    %81 = vector.broadcast %80 : vector<1x1x128xf32> to vector<8x16x128xf32>
    %82 = arith.mulf %78, %81 : vector<8x16x128xf32>
    %83 = arith.addf %77, %82 : vector<8x16x128xf32>
    %c2_40 = arith.constant 2 : index
    %c2_41 = arith.constant 2 : index
    %c0_42 = arith.constant 0 : index
    %84 = vector.load %arg10[%c2_40, %c2_41, %c0_42] : memref<10x24x128xf32, #tpu.memory_space<vmem>>, vector<8x16x128xf32>
    %85 = vector.extract_strided_slice %34 {offsets = [8, 0], sizes = [1, 128], strides = [1, 1]} : vector<9x128xf32> to vector<1x128xf32>
    %86 = vector.shape_cast %85 : vector<1x128xf32> to vector<1x1x128xf32>
    %87 = vector.broadcast %86 : vector<1x1x128xf32> to vector<8x16x128xf32>
    %88 = arith.mulf %84, %87 : vector<8x16x128xf32>
    %89 = arith.addf %83, %88 : vector<8x16x128xf32>
    %c0_43 = arith.constant 0 : index
    %c0_44 = arith.constant 0 : index
    %90 = vector.load %arg6[%c0_43, %c0_44] : memref<1x128xf32, #tpu.memory_space<vmem>>, vector<1x128xf32>
    %91 = vector.shape_cast %90 : vector<1x128xf32> to vector<1x1x128xf32>
    %92 = vector.broadcast %91 : vector<1x1x128xf32> to vector<8x16x128xf32>
    %93 = arith.addf %89, %92 : vector<8x16x128xf32>
    %cst_45 = arith.constant 0.000000e+00 : f32
    %cst_46 = arith.constant 6.000000e+00 : f32
    %94 = vector.broadcast %cst_45 : f32 to vector<8x16x128xf32>
    %95 = arith.maximumf %94, %93 : vector<8x16x128xf32>
    %96 = vector.broadcast %cst_46 : f32 to vector<8x16x128xf32>
    %97 = arith.minimumf %96, %95 : vector<8x16x128xf32>
    %98 = vector.shape_cast %97 : vector<8x16x128xf32> to vector<128x128xf32>
    %99 = arith.truncf %98 : vector<128x128xf32> to vector<128x128xbf16>
    %c0_47 = arith.constant 0 : index
    %c0_48 = arith.constant 0 : index
    %100 = vector.load %arg7[%c0_47, %c0_48] : memref<128x128xbf16, #tpu.memory_space<vmem>>, vector<128x128xbf16>
    %cst_49 = arith.constant dense<0.000000e+00> : vector<128x128xf32>
    %101 = tpu.matmul %99, %100, %cst_49 {dimension_numbers = #tpu.dot_dimension_numbers<[1], [0], [0], [1], [0, 0, 1, 1], [], []>} : vector<128x128xbf16>, vector<128x128xbf16>, vector<128x128xf32> -> vector<128x128xf32>
    %c0_50 = arith.constant 0 : index
    %c0_51 = arith.constant 0 : index
    %102 = vector.load %arg8[%c0_50, %c0_51] : memref<1x128xf32, #tpu.memory_space<vmem>>, vector<1x128xf32>
    %103 = vector.broadcast %102 : vector<1x128xf32> to vector<128x128xf32>
    %104 = arith.addf %101, %103 : vector<128x128xf32>
    %c1_i32_52 = arith.constant 1 : i32
    %105 = arith.addi %1, %c1_i32_52 : i32
    %c0_53 = arith.constant 0 : index
    %106 = arith.index_cast %105 : i32 to index
    %c1_54 = arith.constant 1 : index
    %c0_55 = arith.constant 0 : index
    %107 = vector.load %arg2[%c0_53, %106, %c1_54, %c0_55] : memref<1x18x24x128xf32, #tpu.memory_space<vmem>>, vector<1x8x16x128xf32>
    %108 = vector.shape_cast %107 : vector<1x8x16x128xf32> to vector<8x16x128xf32>
    %109 = vector.shape_cast %108 : vector<8x16x128xf32> to vector<128x128xf32>
    %110 = arith.addf %104, %109 : vector<128x128xf32>
    %111 = vector.shape_cast %110 : vector<128x128xf32> to vector<8x16x128xf32>
    %c0_56 = arith.constant 0 : index
    %c0_57 = arith.constant 0 : index
    %c0_58 = arith.constant 0 : index
    %c0_59 = arith.constant 0 : index
    %112 = vector.load %arg9[%c0_56, %c0_57, %c0_58, %c0_59] : memref<1x8x16x128xf32, #tpu.memory_space<vmem>>, vector<1x8x16x128xf32>
    %113 = vector.shape_cast %112 : vector<1x8x16x128xf32> to vector<8x16x128xf32>
    %114 = vector.shape_cast %111 : vector<8x16x128xf32> to vector<1x8x16x128xf32>
    tpu.vector_store %arg9[%c0_56, %c0_57, %c0_58, %c0_59], %114 {strides = array<i32>} : memref<1x8x16x128xf32, #tpu.memory_space<vmem>>, vector<1x8x16x128xf32>,
    return
  }
  func.func @transform_0(%arg0: i32, %arg1: i32) -> (i32, i32, i32, i32) {
    %c0_i32 = arith.constant 0 : i32
    %c0_i32_0 = arith.constant 0 : i32
    %c0_i32_1 = arith.constant 0 : i32
    %c0_i32_2 = arith.constant 0 : i32
    return %arg0, %c0_i32, %c0_i32_0, %c0_i32_1 : i32, i32, i32, i32
  }
  func.func @transform_1(%arg0: i32, %arg1: i32) -> (i32, i32) {
    %c0_i32 = arith.constant 0 : i32
    %c0_i32_0 = arith.constant 0 : i32
    %c0_i32_1 = arith.constant 0 : i32
    return %c0_i32, %c0_i32_0 : i32, i32
  }
  func.func @transform_2(%arg0: i32, %arg1: i32) -> (i32, i32) {
    %c0_i32 = arith.constant 0 : i32
    %c0_i32_0 = arith.constant 0 : i32
    %c0_i32_1 = arith.constant 0 : i32
    return %c0_i32, %c0_i32_0 : i32, i32
  }
  func.func @transform_3(%arg0: i32, %arg1: i32) -> (i32, i32) {
    %c0_i32 = arith.constant 0 : i32
    %c0_i32_0 = arith.constant 0 : i32
    %c0_i32_1 = arith.constant 0 : i32
    return %c0_i32, %c0_i32_0 : i32, i32
  }
  func.func @transform_4(%arg0: i32, %arg1: i32) -> (i32, i32) {
    %c0_i32 = arith.constant 0 : i32
    %c0_i32_0 = arith.constant 0 : i32
    %c0_i32_1 = arith.constant 0 : i32
    return %c0_i32, %c0_i32_0 : i32, i32
  }
  func.func @transform_5(%arg0: i32, %arg1: i32) -> (i32, i32) {
    %c0_i32 = arith.constant 0 : i32
    %c0_i32_0 = arith.constant 0 : i32
    %c0_i32_1 = arith.constant 0 : i32
    return %c0_i32, %c0_i32_0 : i32, i32
  }
  func.func @transform_6(%arg0: i32, %arg1: i32) -> (i32, i32) {
    %c0_i32 = arith.constant 0 : i32
    %c0_i32_0 = arith.constant 0 : i32
    %c0_i32_1 = arith.constant 0 : i32
    return %c0_i32, %c0_i32_0 : i32, i32
  }
  func.func @transform_7(%arg0: i32, %arg1: i32) -> (i32, i32, i32, i32) {
    %c0_i32 = arith.constant 0 : i32
    %c0_i32_0 = arith.constant 0 : i32
    %c0_i32_1 = arith.constant 0 : i32
    return %arg0, %arg1, %c0_i32, %c0_i32_0 : i32, i32, i32, i32
  }
}

</mosaic_0001>

<bundles_post_ra>
// kernel: tpu_custom_call.1
= control target key start
LH: loop header
LB: loop body
LE: loop exit
PB: predicated region body
PF: predicated region fallthrough
CT: control target
= control target key end

     0   :  { %s3268_s0 = inlined_call_operand.hbm [shape: f32[2,18,24,128], index: 0, kind: input, shape index: {}]   ;;  %s3269_s1 = inlined_call_operand.hbm [shape: bf16[128,128], index: 1, kind: input, shape index: {}]   ;;  %s3270_s2 = inlined_call_operand.vmem [shape: f32[1,128], index: 2, kind: input, shape index: {}]   ;;  %s3271_s3 = inlined_call_operand.hbm [shape: f32[9,128], index: 3, kind: input, shape index: {}]   ;;  %s3272_s4 = inlined_call_operand.vmem [shape: f32[1,128], index: 4, kind: input, shape index: {}]   ;;  %s3273_s5 = inlined_call_operand.hbm [shape: bf16[128,128], index: 5, kind: input, shape index: {}]   ;;  %s3274_s6 = inlined_call_operand.vmem [shape: f32[1,128], index: 6, kind: input, shape index: {}]   ;;  %s3275_s7 = inlined_call_operand.hbm [shape: f32[2,16,16,128], index: 7, kind: output, shape index: {}]  }
   0x1   :  { %3290 = sst [smem:[#allocation20_spill]] %s3269_s1 }
   0x2   :  { %3291 = sst [smem:[#allocation21_spill]] %s3271_s3 }
   0x3   :  { %3292 = sst [smem:[#allocation22_spill]] %s3272_s4 }
   0x4   :  { %3293 = sst [smem:[#allocation23_spill]] %s3273_s5 }
   0x5   :  { %3294 = sst [smem:[#allocation24_spill]] %s3274_s6 }
   0x6   :  { %3295 = sst [smem:[#allocation25_spill]] %s3275_s7 }
   0x7   :  { %12 = vsyncpa [#allocation4], 0 }
   0x8   :  { %14 = vsyncpa [#allocation4 + $0x1], 0 }
   0x9   :  { %15 = vsyncpa [#allocation7], 0 }
   0xa   :  { %16 = vsyncpa [#allocation10], 0 }
   0xb   :  { %17 = vsyncpa [#allocation5], 0 }
   0xc   :  { %19 = vsyncpa [#allocation5 + $0x1], 0  ;;  %s2365_s24 = smov 0   ;;  %s2367_s25 = smov 0  }
   0xd   :  { %s2369_s26 = smov 0   ;;  %s2371_s27 = smov 0  }
   0xe   :  { %s2373_s28 = smov 0   ;;  %s2375_s29 = smov 0  }
   0xf   :  { %s2377_s30 = smov 0   ;;  %s2379_s8 = smov 0  }
  0x10   :  { %s2381_s9 = smov 0   ;;  %s2383_s10 = smov 0  }
  0x11   :  { %s2385_s11 = smov 0  }
  0x12 LB: > { %3296 = sst [smem:[#allocation16_spill]] %s2268_s24  ;;  %s1676_s12 = sadd.s32 4294967295, %s2308_s11   ;;  %s2308_s11 = sphi %s2385_s11, %s25_s11   ;;  %s2304_s10 = sphi %s2383_s10, %s3339_s10   ;;  %s2300_s9 = sphi %s2381_s9, %s3338_s9   ;;  %s2296_s8 = sphi %s2379_s8, %s3337_s8   ;;  %s2292_s30 = sphi %s2377_s30, %s3336_s30   ;;  %s2288_s29 = sphi %s2375_s29, %s3335_s29   ;;  %s2284_s28 = sphi %s2373_s28, %s3334_s28   ;;  %s2280_s27 = sphi %s2371_s27, %s3333_s27   ;;  %s2276_s26 = sphi %s2369_s26, %s3332_s26   ;;  %s2272_s25 = sphi %s2367_s25, %s3331_s25   ;;  %s2268_s24 = sphi %s2365_s24, %s3330_s24  }
  0x13   : > { %3297 = sst [smem:[#allocation17_spill]] %s2296_s8  ;;  %s1677_s13 = sadd.s32 4294967294, %s2308_s11  }
  0x14   : > { %p57_p0 = scmp.ne.s32.totalorder %s2284_s28, %s2280_s27  ;;  %p2421_p1 = scmp.eq.s32.totalorder %s1676_s12, 0 }
  0x15   : > { %p208_p2 = scmp.ne.s32.totalorder %s2276_s26, %s2272_s25  ;;  %p209_p4 = scmp.eq.s32.totalorder %s1676_s12, 3 }
  0x16   : > { %s3298_s14 = scalar_select %p2421_p1, 1, 0 }
  0x17   : > { %p2430_p3 = por %p2421_p1, %p57_p0  ;;  %p214_p5 = scmp.ne.s32.totalorder %s2272_s25, %s2268_s24 }
  0x18   : > { %p215_p6 = scmp.eq.s32.totalorder %s1677_s13, 3  ;;  %p2436_p7 = por %p209_p4, %p208_p2 }
  0x19   : > { %s3299_s16 = scalar_select %p2430_p3, 1, 0 }
  0x1a   : > { %s3300_s17 = scalar_select %p2436_p7, 1, 0 }
  0x1b   : > { %p1678_p8 = scmp.ge.s32.totalorder %s2308_s11, 1  ;;  %p2441_p9 = por %p215_p6, %p214_p5 }
  0x1c   : > { %3301 = sst [smem:[#allocation18_spill]] %s3300_s17  ;;  %p222_p10 = scmp.lt.s32.totalorder %s2308_s11, 5 }
  0x1d   : > { %s3302_s18 = scalar_select %p2441_p9, 1, 0 }
  0x1e   : > { %p2446_p11 = pnand %p1678_p8, %p222_p10  ;;  %s2310_s20 = smov [#allocation6]  }
  0x1f   : > { %3303 = sst [smem:[#allocation19_spill]] %s3302_s18  ;;  %s234_s21 = sshll.u32 %s2310_s20, 4  ;;  %s235_s21 = int_to_ptr.vmem [resolvable:$true] %s234_s21 }
  0x20   : > { %s3304_s19 = scalar_select %p2446_p11, 1, 0 }
  0x21   : > { %p1921_p12 = pneg %p2446_p11  ;;  %s2311_s23 = smov [#allocation8]  }
  0x22   : > { %s250_s27 = sshll.u32 %s2311_s23, 4  ;;  %s3306_s1 = sld [smem:[#allocation20_spill]]  ;;  %s2458_s27 = int_to_ptr.vmem [resolvable:$true] %s250_s27 }
  0x23   : > { %p2454_p13 = pnand %p1921_p12, %p2421_p1 }
  0x25   : > { %p2468_p2 = pneg %p2454_p13 }
  0x28   : > { %s2064_s15 = scalar_lea.hbm %s3306_s1, 1024 }
  0x29   : > { %p2065_p0 = scmp.ne.s32.totalorder %s3306_s1, %s2064_s15  ;;  %p2071_p6 = scmp.lt.u32.totalorder %s2064_s15, %s3306_s1 }
  0x2b   : > { %p2067_p4 = pnand %p2468_p2, %p2065_p0 }
  0x2d   : > { %p2068_p5 = pneg %p2067_p4 }
  0x2f   : > { %p2073_p8 = pnand %p2071_p6, %p2068_p5 }
  0x31   : > { %2076 = shalt.err (!%p2073_p8)
}
  0x32   : > { %s2077_s12 = scalar_lea.vmem %s235_s21, 1024  ;;  %p2085_p7 = scmp.lt.s32.totalorder %s235_s21, %s235_s21 }
  0x33   : > { %p2078_p10 = scmp.ne.s32.totalorder %s235_s21, %s2077_s12  ;;  %p2086_p1 = scmp.lt.s32.totalorder %s2077_s12, %s2077_s12 }
  0x35   : > { %p2080_p12 = pnand %p2078_p10, %p2468_p2  ;;  %p2087_p3 = por %p2086_p1, %p2085_p7 }
  0x37   : > { %p2081_p9 = pneg %p2080_p12 }
  0x39   : > { %p2088_p11 = pnand %p2087_p3, %p2081_p9 }
  0x3b   : > { %2091 = shalt.err (!%p2088_p11)
}
  0x3c   : > { %s3286_s24 = smov 64   ;;  %s3287_s18 = smov 4  }
  0x3d   : > { %1924 = dma.hbm_to_vmem [thread:$0]  (!%p2454_p13), %s3306_s1, 1024, %s235_s21, [#allocation7], %s3286_s24, %s3286_s24, %s3287_s18  }
  0x3e   : > { %s3308_s3 = sld [smem:[#allocation21_spill]] }
  0x44   : > { %s2092_s17 = scalar_lea.hbm %s3308_s3, 256 }
  0x45   : > { %p2093_p1 = scmp.ne.s32.totalorder %s3308_s3, %s2092_s17  ;;  %p2099_p9 = scmp.lt.u32.totalorder %s2092_s17, %s3308_s3 }
  0x47   : > { %p2095_p3 = pnand %p2093_p1, %p2468_p2 }
  0x49   : > { %p2096_p7 = pneg %p2095_p3 }
  0x4b   : > { %p2101_p11 = pnand %p2099_p9, %p2096_p7 }
  0x4d   : > { %2104 = shalt.err (!%p2101_p11)
}
  0x4e   : > { %s2105_s21 = scalar_lea.vmem %s2458_s27, 256  ;;  %p2113_p6 = scmp.lt.s32.totalorder %s2458_s27, %s2458_s27 }
  0x4f   : > { %p2106_p0 = scmp.ne.s32.totalorder %s2458_s27, %s2105_s21  ;;  %p2114_p8 = scmp.lt.s32.totalorder %s2105_s21, %s2105_s21 }
  0x51   : > { %p2108_p4 = pnand %p2106_p0, %p2468_p2  ;;  %p2115_p10 = por %p2114_p8, %p2113_p6 }
  0x53   : > { %p2109_p5 = pneg %p2108_p4 }
  0x55   : > { %p2116_p12 = pnand %p2115_p10, %p2109_p5 }
  0x57   : > { %2119 = shalt.err (!%p2116_p12)
}
  0x58   : > { %s3288_s8 = smov 128   ;;  %s3289_s4 = smov 8  }
  0x59   : > { %1927 = dma.hbm_to_vmem [thread:$0]  (!%p2454_p13), %s3308_s3, 256, %s2458_s27, [#allocation7], %s3288_s8, %s3288_s8, %s3289_s4  }
  0x5a   : > { %s2316_s7 = smov [#allocation9]   ;;  %s3309_s5 = sld [smem:[#allocation23_spill]] }
  0x5b   : > { %s266_s15 = sshll.u32 %s2316_s7, 4  ;;  %s267_s15 = int_to_ptr.vmem [resolvable:$true] %s266_s15 }
  0x60   : > { %s2120_s12 = scalar_lea.hbm %s3309_s5, 1024 }
  0x61   : > { %p2121_p1 = scmp.ne.s32.totalorder %s3309_s5, %s2120_s12  ;;  %p2127_p9 = scmp.lt.u32.totalorder %s2120_s12, %s3309_s5 }
  0x63   : > { %p2123_p3 = pnand %p2121_p1, %p2468_p2 }
  0x65   : > { %p2124_p7 = pneg %p2123_p3 }
  0x67   : > { %p2129_p11 = pnand %p2127_p9, %p2124_p7 }
  0x69   : > { %2132 = shalt.err (!%p2129_p11)
}
  0x6a   : > { %s2133_s27 = scalar_lea.vmem %s267_s15, 1024  ;;  %p2141_p6 = scmp.lt.s32.totalorder %s267_s15, %s267_s15 }
  0x6b   : > { %p2134_p0 = scmp.ne.s32.totalorder %s267_s15, %s2133_s27  ;;  %p2142_p8 = scmp.lt.s32.totalorder %s2133_s27, %s2133_s27 }
  0x6d   : > { %p2136_p4 = pnand %p2134_p0, %p2468_p2  ;;  %p2143_p10 = por %p2142_p8, %p2141_p6 }
  0x6f   : > { %p2137_p5 = pneg %p2136_p4 }
  0x71   : > { %p2144_p12 = pnand %p2143_p10, %p2137_p5 }
  0x73   : > { %2147 = shalt.err (!%p2144_p12)
}
  0x74   : > { %s3310_s24 = smov 4   ;;  %s3311_s6 = smov 64  }
  0x75   : > { %1930 = dma.hbm_to_vmem [thread:$0]  (!%p2454_p13), %s3309_s5, 1024, %s267_s15, [#allocation10], %s3311_s6, %s3311_s6, %s3310_s24  }
  0x76   : > { %s34_s20 = sadd.s32 1, %s2300_s9  ;;  %s37_s22 = sadd.s32 1, %s2304_s10 }
  0x77   : > { %p35_p2 = scmp.ge.s32.totalorder %s34_s20, 2  ;;  %s44_s17 = sadd.s32 1, %s2288_s29 }
  0x78   : > { %p51_p1 = scmp.ne.s32.totalorder %s2288_s29, %s2284_s28  ;;  %p52_p3 = scmp.eq.s32.totalorder %s2308_s11, 0 }
  0x79   : > { %s3341_s20 = smov (%p35_p2, %s34_s20), 0  ;;  %s3343_s22 = smov (!%p35_p2, %s37_s22), %s2304_s10 }
  0x7a   : > { %s194_s7 = ssub.s32 %s2300_s9, %s3341_s20  ;;  %p39_p7 = scmp.ge.s32.totalorder %s3343_s22, 2 }
  0x7b   : > { %p1942_p9 = scmp.lt.s32.totalorder %s2308_s11, 4  ;;  %p2546_p13 = por %p52_p3, %p51_p1 }
  0x7c   : > { %s283_s13 = sand.u32 1, %s2288_s29   ;;  %s3345_s22 = smov (%p39_p7, %s3343_s22), 0 }
  0x7d   : > { %s1902_s23 = smul.u32 432, %s283_s13  ;;  %s41_s12 = ssub.s32 %s2304_s10, %s3345_s22 }
  0x7e   : > { %s1903_s21 = smul.u32 6912, %s2304_s10  ;;  %p42_p11 = scmp.eq.s32.totalorder %s41_s12, 0 }
  0x7f   : > { %s195_s27 = sor.u32 %s194_s7, %s41_s12  ;;  %s3313_s6 = sadd.s32 1, %s2276_s26 }
  0x80   : > { %p196_p0 = scmp.eq.s32.totalorder %s195_s27, 0  ;;  %s2567_s4 = scalar_lea.hbm %s3268_s0, %s1903_s21 }
  0x81   : > { %s2557_s24 = scalar_select %p42_p11, %s2288_s29, %s44_s17  }
  0x82   : > { %s2562_s1 = scalar_select %p196_p0, %s2276_s26, %s3313_s6  }
  0x83   : > { %s287_s3 = scalar_lea.vmem [#allocation3], %s1902_s23  ;;  %p2575_p4 = pnand %p1942_p9, %p2546_p13 }
  0x84   : > { %s294_s5 = sshll.u32 %s287_s3, 4  ;;  %s2579_s7 = scalar_lea.sflag [#allocation4], %s283_s13  ;;  %s2569_s5 = int_to_ptr.vmem [resolvable:$true] %s294_s5 }
  0x85   : > { %s2148_s8 = scalar_lea.hbm %s2567_s4, 6912  ;;  %p2150_p6 = pneg %p2575_p4 }
  0x86   : > { %p2149_p5 = scmp.ne.s32.totalorder %s2567_s4, %s2148_s8  ;;  %s2153_s15 = scalar_lea.hbm %s3268_s0, 13824 }
  0x87   : > { %p2154_p12 = scmp.lt.u32.totalorder %s2567_s4, %s3268_s0  ;;  %p2155_p2 = scmp.lt.u32.totalorder %s2153_s15, %s2148_s8 }
  0x88   : > { %p2151_p8 = pnand %p2150_p6, %p2149_p5  ;;  %p2157_p3 = scmp.lt.u32.totalorder %s2148_s8, %s2567_s4 }
  0x89   : > { %p2156_p1 = por %p2155_p2, %p2154_p12 }
  0x8a   : > { %p2152_p10 = pneg %p2151_p8 }
  0x8b   : > { %p2158_p7 = por %p2157_p3, %p2156_p1 }
  0x8d   : > { %p2159_p9 = pnand %p2158_p7, %p2152_p10 }
  0x8f   : > { %2162 = shalt.err (!%p2159_p9)
}
  0x90   : > { %s2163_s13 = scalar_lea.vmem %s2569_s5, 6912  ;;  %s2317_s27 = smov [#allocation3]  }
  0x91   : > { %p2164_p13 = scmp.ne.s32.totalorder %s2569_s5, %s2163_s13  ;;  %s2168_s6 = sshll.u32 %s2317_s27, 4  ;;  %s2169_s6 = int_to_ptr.vmem [resolvable:$false] %s2168_s6 }
  0x92   : > { %s2170_s18 = scalar_lea.vmem %s2169_s6, 13824  ;;  %p2171_p5 = scmp.lt.s32.totalorder %s2569_s5, %s2169_s6 }
  0x93   : > { %p2166_p11 = pnand %p2164_p13, %p2150_p6  ;;  %p2172_p8 = scmp.lt.s32.totalorder %s2170_s18, %s2163_s13 }
  0x95   : > { %p2167_p0 = pneg %p2166_p11  ;;  %p2173_p12 = por %p2172_p8, %p2171_p5 }
  0x97   : > { %p2174_p2 = pnand %p2173_p12, %p2167_p0 }
  0x99   : > { %2177 = shalt.err (!%p2174_p2)
}
  0x9a   : > { %s3315_s8 = smov 8   ;;  %s3316_s3 = smov 128  }
  0x9b   : > { %1934 = dma.hbm_to_vmem [thread:$0]  (!%p2575_p4), %s2567_s4, 6912, %s2569_s5, %s2579_s7, %s3316_s3, %s3316_s3, %s3315_s8  }
  0x9c   : > { %p3317_p6 = scmp.ne.s32.totalorder %s3304_s19, 0 }
  0x9d   : > { %s308_s23 = sand.u32 (!%p3317_p6), 1, %s2284_s28   ;;  %p3318_p10 = scmp.ne.s32.totalorder (!%p3317_p6), %s3299_s16, 0 }
  0x9e   : > { %306 = sbr.rel (%p3317_p6) target bundleno = 839 (0x347), region = 48  ;;  %s309_s12 = scalar_lea.sflag (!%p3317_p6), [#allocation4], %s308_s23 }
  0x9f   : > { %s2613_s15 = smul.u32 (!%p3317_p6), 432, %s308_s23 }
  0xa1   : > { %s312_s21 = scalar_lea.vmem (!%p3317_p6), [#allocation3], %s2613_s15 }
  0xa5   : > { %2251 = dma.done.wait (%p3318_p10), %s309_s12, 6912  }
  0xa6   : > { %2253 = vsyncadd (%p3318_p10), %s309_s12, 4294960384  ;;  %p3319_p1 = scmp.ne.s32.totalorder %s3298_s14, 0 }
  0xa8   : > { %2255 = dma.done.wait (%p3319_p1), [#allocation7], 1280  }
  0xa9   : > { %2257 = vsyncadd (%p3319_p1), [#allocation7], 4294966016 }
  0xaa   : > { %2259 = dma.done.wait (%p3319_p1), [#allocation10], 1024  }
  0xab   : > { %2261 = vsyncadd (%p3319_p1), [#allocation10], 4294966272  ;;  %s352_s5 = sand.u32 1, %s2272_s25   ;;  %v2318_v0 = vmov 0.0   ;;  %vm2319_vm0 = vmmov 0   ;;  %v2048_v1 = vld [vmem:[#allocation6] sm:$0xff]   ;;  %v689_v54 = vlaneseq }
  0xac   : > { %s2631_s19 = sshll.u32 %s352_s5, 7  ;;  %1778 = vmatprep.subr.bf16.mxu0 %v2318_v0  ;;  %1794 = vmatprep.mubr.msk.bf16.mxu0 %vm2319_vm0, %v2318_v0  ;;  %v2049_v2 = vld [vmem:[#allocation6 + $0x8] sm:$0xff]   ;;  %v2050_v3 = vld [vmem:[#allocation6 + $0x10] sm:$0xff]   ;;  %v2051_v4 = vld [vmem:[#allocation6 + $0x18] sm:$0xff]   ;;  %s1690_s14 = smul.u32 192, %s2292_s30 }
  0xad   : > { %1886 = vmatprep.subr.bf16.mxu1 %v2318_v0  ;;  %1834 = vmatprep.mubr.msk.bf16.mxu1 %vm2319_vm0, %v2318_v0  ;;  %v2052_v5 = vld [vmem:[#allocation6 + $0x20] sm:$0xff]   ;;  %v2053_v6 = vld [vmem:[#allocation6 + $0x28] sm:$0xff]   ;;  %v2054_v7 = vld [vmem:[#allocation6 + $0x30] sm:$0xff]   ;;  %v2719_v57 = vshrl.u32 %v689_v54, 7  ;;  %s2797_s7 = scalar_lea.vmem [#allocation11], %s2631_s19  ;;  %p1700_p4 = scmp.ne.s32.totalorder %s2292_s30, 0 }
  0xae   : > { %1779 = vmatpush3.bf16.msra.mxu0 %v2048_v1  ;;  %1894 = vmatpush3.bf16.msra.mxu1 %v2048_v1  ;;  %s2652_s16 = scalar_lea.vmem %s312_s21, %s1690_s14 [#allocation3]  ;;  %v2055_v8 = vld [vmem:[#allocation6 + $0x38] sm:$0xff]   ;;  %v2717_v55 = vld [vmem:[%s3270_s2] ss:$0 sm:$0xff] }
  0xaf   : > { %1780 = vmatprep.subr.bf16.mxu0 %v2318_v0  ;;  %1887 = vmatprep.subr.bf16.mxu1 %v2318_v0  ;;  %v360_v9 = vld [vmem:[%s2652_s16] sm:$0xff]  ;;  %v361_v10 = vld [vmem:[%s2652_s16 + $0x8] sm:$0xff]  ;;  %v362_v15 = vld [vmem:[%s2652_s16 + $0x10] sm:$0xff]  ;;  %vm693_vm1 = vcmp.ge.s32.totalorder %v2719_v57, 1 }
  0xb0   : > { %v380_v11 = vld [vmem:[%s2652_s16 + $0xa0] sm:$0xff]  ;;  %v381_v12 = vld [vmem:[%s2652_s16 + $0xa8] sm:$0xff]  ;;  %v390_v13 = vpack.c.bf16 %v361_v10, %v360_v9  ;;  %v363_v16 = vld [vmem:[%s2652_s16 + $0x18] sm:$0xff] }
  0xb1   : > { %v400_v14 = vpack.c.bf16 %v381_v12, %v380_v11  ;;  %v382_v17 = vld [vmem:[%s2652_s16 + $0xb0] sm:$0xff]  ;;  %v383_v18 = vld [vmem:[%s2652_s16 + $0xb8] sm:$0xff]  ;;  %v391_v19 = vpack.c.bf16 %v363_v16, %v362_v15  ;;  %v364_v21 = vld [vmem:[%s2652_s16 + $0x20] sm:$0xff] }
  0xb2   : > { %1781 = vmatpush3.bf16.msra.mxu0 %v2049_v2  ;;  %1895 = vmatpush3.bf16.msra.mxu1 %v2049_v2  ;;  %v401_v20 = vpack.c.bf16 %v383_v18, %v382_v17  ;;  %v365_v22 = vld [vmem:[%s2652_s16 + $0x28] sm:$0xff]  ;;  %v384_v23 = vld [vmem:[%s2652_s16 + $0xc0] sm:$0xff]  ;;  %v366_v27 = vld [vmem:[%s2652_s16 + $0x30] sm:$0xff] }
  0xb3   : > { %1782 = vmatprep.subr.bf16.mxu0 %v2318_v0  ;;  %1888 = vmatprep.subr.bf16.mxu1 %v2318_v0  ;;  %v385_v24 = vld [vmem:[%s2652_s16 + $0xc8] sm:$0xff]  ;;  %v392_v25 = vpack.c.bf16 %v365_v22, %v364_v21  ;;  %v367_v28 = vld [vmem:[%s2652_s16 + $0x38] sm:$0xff]  ;;  %v386_v29 = vld [vmem:[%s2652_s16 + $0xd0] sm:$0xff] }
  0xb4   : > { %v402_v26 = vpack.c.bf16 %v385_v24, %v384_v23  ;;  %v387_v30 = vld [vmem:[%s2652_s16 + $0xd8] sm:$0xff]  ;;  %v393_v31 = vpack.c.bf16 %v367_v28, %v366_v27  ;;  %v368_v33 = vld [vmem:[%s2652_s16 + $0x40] sm:$0xff]  ;;  %v369_v34 = vld [vmem:[%s2652_s16 + $0x48] sm:$0xff] }
  0xb5   : > { %v403_v32 = vpack.c.bf16 %v387_v30, %v386_v29  ;;  %v388_v35 = vld [vmem:[%s2652_s16 + $0xe0] sm:$0xff]  ;;  %v389_v36 = vld [vmem:[%s2652_s16 + $0xe8] sm:$0xff]  ;;  %v394_v37 = vpack.c.bf16 %v369_v34, %v368_v33  ;;  %v370_v39 = vld [vmem:[%s2652_s16 + $0x50] sm:$0xff] }
  0xb6   : > { %1783 = vmatpush3.bf16.msra.mxu0 %v2050_v3  ;;  %1896 = vmatpush3.bf16.msra.mxu1 %v2050_v3  ;;  %v404_v38 = vpack.c.bf16 %v389_v36, %v388_v35  ;;  %v371_v40 = vld [vmem:[%s2652_s16 + $0x58] sm:$0xff]  ;;  %v372_v42 = vld [vmem:[%s2652_s16 + $0x60] sm:$0xff]  ;;  %v373_v43 = vld [vmem:[%s2652_s16 + $0x68] sm:$0xff] }
  0xb7   : > { %1784 = vmatprep.subr.bf16.mxu0 %v2318_v0  ;;  %1889 = vmatprep.subr.bf16.mxu1 %v2318_v0  ;;  %v395_v41 = vpack.c.bf16 %v371_v40, %v370_v39  ;;  %v396_v44 = vpack.c.bf16 %v373_v43, %v372_v42  ;;  %v374_v45 = vld [vmem:[%s2652_s16 + $0x70] sm:$0xff]  ;;  %v375_v46 = vld [vmem:[%s2652_s16 + $0x78] sm:$0xff]  ;;  %v376_v48 = vld [vmem:[%s2652_s16 + $0x80] sm:$0xff] }
  0xb8   : > { %v397_v47 = vpack.c.bf16 %v375_v46, %v374_v45  ;;  %v377_v49 = vld [vmem:[%s2652_s16 + $0x88] sm:$0xff]  ;;  %v378_v51 = vld [vmem:[%s2652_s16 + $0x90] sm:$0xff]  ;;  %v379_v52 = vld [vmem:[%s2652_s16 + $0x98] sm:$0xff] }
  0xb9   : > { %v398_v50 = vpack.c.bf16 %v377_v49, %v376_v48  ;;  %v399_v53 = vpack.c.bf16 %v379_v52, %v378_v51 }
  0xba   : > { %1785 = vmatpush3.bf16.msra.mxu0 %v2051_v4  ;;  %1897 = vmatpush3.bf16.msra.mxu1 %v2051_v4 }
  0xbb   : > { %1786 = vmatprep.subr.bf16.mxu0 %v2318_v0  ;;  %1890 = vmatprep.subr.bf16.mxu1 %v2318_v0 }
  0xbe   : > { %1787 = vmatpush3.bf16.msra.mxu0 %v2052_v5  ;;  %1898 = vmatpush3.bf16.msra.mxu1 %v2052_v5 }
  0xbf   : > { %1788 = vmatprep.subr.bf16.mxu0 %v2318_v0  ;;  %1891 = vmatprep.subr.bf16.mxu1 %v2318_v0 }
  0xc2   : > { %1789 = vmatpush3.bf16.msra.mxu0 %v2053_v6  ;;  %1899 = vmatpush3.bf16.msra.mxu1 %v2053_v6 }
  0xc3   : > { %1790 = vmatprep.subr.bf16.mxu0 %v2318_v0  ;;  %1892 = vmatprep.subr.bf16.mxu1 %v2318_v0 }
  0xc6   : > { %1791 = vmatpush3.bf16.msra.mxu0 %v2054_v7  ;;  %1900 = vmatpush3.bf16.msra.mxu1 %v2054_v7 }
  0xc7   : > { %1792 = vmatprep.subr.bf16.mxu0 %v2318_v0  ;;  %1893 = vmatprep.subr.bf16.mxu1 %v2318_v0 }
  0xca   : > { %1793 = vmatpush3.bf16.msra.mxu0 %v2055_v8  ;;  %1901 = vmatpush3.bf16.msra.mxu1 %v2055_v8 }
  0xcd   : > { %1795 = vmatmul.mubr.bf16.vlgmr.msra.gmra.mrb[0].mxu0 %v390_v13  ;;  %1835 = vmatmul.mubr.bf16.vlgmr.msra.gmra.mrb[0].mxu1 %v400_v14 }
  0xce   : > { %1798 = vmatprep.mubr.msk.bf16.mxu0 %vm2319_vm0, %v2318_v0  ;;  %1838 = vmatprep.mubr.msk.bf16.mxu1 %vm2319_vm0, %v2318_v0 }
  0xd5   : > { %1799 = vmatmul.mubr.bf16.gmra.mrb[4].mxu0 %v391_v19  ;;  %1839 = vmatmul.mubr.bf16.gmra.mrb[4].mxu1 %v401_v20 }
  0xd6   : > { %1802 = vmatprep.mubr.msk.bf16.mxu0 %vm2319_vm0, %v2318_v0  ;;  %1842 = vmatprep.mubr.msk.bf16.mxu1 %vm2319_vm0, %v2318_v0 }
  0xdd   : > { %1803 = vmatmul.mubr.bf16.gmra.mrb[8].mxu0 %v392_v25  ;;  %1843 = vmatmul.mubr.bf16.gmra.mrb[8].mxu1 %v402_v26 }
  0xde   : > { %1806 = vmatprep.mubr.msk.bf16.mxu0 %vm2319_vm0, %v2318_v0  ;;  %1846 = vmatprep.mubr.msk.bf16.mxu1 %vm2319_vm0, %v2318_v0 }
  0xe5   : > { %1807 = vmatmul.mubr.bf16.gmra.mrb[12].mxu0 %v393_v31  ;;  %1847 = vmatmul.mubr.bf16.gmra.mrb[12].mxu1 %v403_v32 }
  0xe6   : > { %1810 = vmatprep.mubr.msk.bf16.mxu0 %vm2319_vm0, %v2318_v0  ;;  %1850 = vmatprep.mubr.msk.bf16.mxu1 %vm2319_vm0, %v2318_v0 }
  0xed   : > { %1811 = vmatmul.mubr.bf16.gmra.mrb[16].mxu0 %v394_v37  ;;  %1851 = vmatmul.mubr.bf16.gmra.mrb[16].mxu1 %v404_v38 }
  0xee   : > { %1814 = vmatprep.mubr.msk.bf16.mxu0 %vm2319_vm0, %v2318_v0 }
  0xf5   : > { %1815 = vmatmul.mubr.bf16.gmra.mrb[20].mxu0 %v395_v41 }
  0xf6   : > { %1818 = vmatprep.mubr.msk.bf16.mxu0 %vm2319_vm0, %v2318_v0 }
  0xfd   : > { %1819 = vmatmul.mubr.bf16.gmra.mrb[24].mxu0 %v396_v44 }
  0xfe   : > { %1822 = vmatprep.mubr.msk.bf16.mxu0 %vm2319_vm0, %v2318_v0 }
 0x105   : > { %1823 = vmatmul.mubr.bf16.gmra.mrb[28].mxu0 %v397_v47 }
 0x106   : > { %1826 = vmatprep.mubr.msk.bf16.mxu0 %vm2319_vm0, %v2318_v0 }
 0x10d   : > { %1827 = vmatmul.mubr.bf16.gmra.mrb[32].mxu0 %v398_v50 }
 0x10e   : > { %1830 = vmatprep.mubr.msk.bf16.mxu0 %vm2319_vm0, %v2318_v0  ;;  %v2724_v0 = vadd.s32 16, %v2719_v57 }
 0x110   : > { %vm698_vm2 = vcmp.le.s32.totalorder %v2724_v0, 16  ;;  %v2320_v0 = vmov (!%p1700_p4), 0.0  }
 0x115   : > { %1831 = vmatmul.mubr.bf16.gmra.mrb[36].mxu0 %v399_v53 }
 0x1a0   : > { %v510_v56 = vpop.f32.mrb[0].mxu0  ;;  %v590_v58 = vpop.f32.mrb[0].mxu1 }
 0x1a1   : > { %v511_v59 = vadd.f32 %v2717_v55, %v510_v56  ;;  %v1796_v60 = vpop.f32.mrb[1].mxu0  ;;  %v591_v61 = vadd.f32 %v2717_v55, %v590_v58  ;;  %v1836_v62 = vpop.f32.mrb[1].mxu1 }
 0x1a2   : > { %v513_v63 = vpop.f32.mrb[2].mxu0  ;;  %v593_v1 = vpop.f32.mrb[2].mxu1 }
 0x1a3   : > { %v629_v2 = vmax.f32 %v511_v59, 0.0  ;;  %v514_v3 = vadd.f32 %v2717_v55, %v513_v63  ;;  %v1797_v4 = vpop.f32.mrb[3].mxu0  ;;  %v649_v5 = vmax.f32 %v591_v61, 0.0  ;;  %v594_v6 = vadd.f32 %v2717_v55, %v593_v1  ;;  %v1837_v7 = vpop.f32.mrb[3].mxu1 }
 0x1a5   : > { %v659_v8 = vmin.f32 %v629_v2, 6.0  ;;  %v630_v9 = vmax.f32 %v514_v3, 0.0  ;;  %v679_v10 = vmin.f32 %v649_v5, 6.0  ;;  %v650_v11 = vmax.f32 %v594_v6, 0.0 }
 0x1a7   : > { %v708_v12 = vsel %vm693_vm1, %v659_v8, 0.0  ;;  %v660_v13 = vmin.f32 %v630_v9, 6.0  ;;  %v728_v14 = vsel %vm698_vm2, %v679_v10, 0.0  ;;  %v680_v15 = vmin.f32 %v650_v11, 6.0 }
 0x1a8   : > { %738 = vst [vmem:[#allocation2] sm:$0xff] %v708_v12  ;;  %v518_v16 = vpop.f32.mrb[4].mxu0  ;;  %758 = vst [vmem:[#allocation2 + $0xa0] sm:$0xff] %v728_v14  ;;  %v598_v17 = vpop.f32.mrb[4].mxu1 }
 0x1a9   : > { %739 = vst [vmem:[#allocation2 + $0x8] sm:$0xff] %v660_v13  ;;  %v519_v18 = vadd.f32 %v2717_v55, %v518_v16  ;;  %v1800_v19 = vpop.f32.mrb[5].mxu0  ;;  %v729_v20 = vsel %vm693_vm1, %v680_v15, 0.0  ;;  %v599_v21 = vadd.f32 %v2717_v55, %v598_v17  ;;  %v1840_v22 = vpop.f32.mrb[5].mxu1  ;;  %772 = vst [vmem:[#allocation2] sm:$0xff] (!%p1700_p4), %v2320_v0 }
 0x1aa   : > { %v521_v23 = vpop.f32.mrb[6].mxu0  ;;  %759 = vst [vmem:[#allocation2 + $0xa8] sm:$0xff] %v729_v20  ;;  %v601_v24 = vpop.f32.mrb[6].mxu1  ;;  %773 = vst [vmem:[#allocation2 + $0x8] sm:$0xff] (!%p1700_p4), %v2320_v0 }
 0x1ab   : > { %v631_v25 = vmax.f32 %v519_v18, 0.0  ;;  %v522_v26 = vadd.f32 %v2717_v55, %v521_v23  ;;  %v1801_v27 = vpop.f32.mrb[7].mxu0  ;;  %v651_v28 = vmax.f32 %v599_v21, 0.0  ;;  %v602_v29 = vadd.f32 %v2717_v55, %v601_v24  ;;  %v1841_v30 = vpop.f32.mrb[7].mxu1 }
 0x1ad   : > { %v661_v31 = vmin.f32 %v631_v25, 6.0  ;;  %v632_v32 = vmax.f32 %v522_v26, 0.0  ;;  %v681_v33 = vmin.f32 %v651_v28, 6.0  ;;  %v652_v34 = vmax.f32 %v602_v29, 0.0 }
 0x1af   : > { %v710_v35 = vsel %vm698_vm2, %v661_v31, 0.0  ;;  %v662_v36 = vmin.f32 %v632_v32, 6.0  ;;  %760 = vst [vmem:[#allocation2 + $0xb0] sm:$0xff] %v681_v33  ;;  %v682_v37 = vmin.f32 %v652_v34, 6.0 }
 0x1b0   : > { %740 = vst [vmem:[#allocation2 + $0x10] sm:$0xff] %v710_v35  ;;  %v526_v38 = vpop.f32.mrb[8].mxu0  ;;  %v606_v39 = vpop.f32.mrb[8].mxu1 }
 0x1b1   : > { %v711_v40 = vsel %vm693_vm1, %v662_v36, 0.0  ;;  %v527_v41 = vadd.f32 %v2717_v55, %v526_v38  ;;  %v1804_v42 = vpop.f32.mrb[9].mxu0  ;;  %v731_v43 = vsel %vm698_vm2, %v682_v37, 0.0  ;;  %v607_v44 = vadd.f32 %v2717_v55, %v606_v39  ;;  %v1844_v45 = vpop.f32.mrb[9].mxu1  ;;  %774 = vst [vmem:[#allocation2 + $0x10] sm:$0xff] (!%p1700_p4), %v2320_v0 }
 0x1b2   : > { %741 = vst [vmem:[#allocation2 + $0x18] sm:$0xff] %v711_v40  ;;  %v529_v46 = vpop.f32.mrb[10].mxu0  ;;  %761 = vst [vmem:[#allocation2 + $0xb8] sm:$0xff] %v731_v43  ;;  %v609_v47 = vpop.f32.mrb[10].mxu1 }
 0x1b3   : > { %v633_v48 = vmax.f32 %v527_v41, 0.0  ;;  %v530_v49 = vadd.f32 %v2717_v55, %v529_v46  ;;  %v1805_v50 = vpop.f32.mrb[11].mxu0  ;;  %v653_v51 = vmax.f32 %v607_v44, 0.0  ;;  %v610_v52 = vadd.f32 %v2717_v55, %v609_v47  ;;  %v1845_v53 = vpop.f32.mrb[11].mxu1 }
 0x1b5   : > { %v663_v54 = vmin.f32 %v633_v48, 6.0  ;;  %v634_v56 = vmax.f32 %v530_v49, 0.0  ;;  %v683_v58 = vmin.f32 %v653_v51, 6.0  ;;  %v654_v59 = vmax.f32 %v610_v52, 0.0 }
 0x1b7   : > { %742 = vst [vmem:[#allocation2 + $0x20] sm:$0xff] %v663_v54  ;;  %v664_v60 = vmin.f32 %v634_v56, 6.0  ;;  %v732_v61 = vsel %vm693_vm1, %v683_v58, 0.0  ;;  %v684_v62 = vmin.f32 %v654_v59, 6.0 }
 0x1b8   : > { %v534_v63 = vpop.f32.mrb[12].mxu0  ;;  %762 = vst [vmem:[#allocation2 + $0xc0] sm:$0xff] %v732_v61  ;;  %v614_v1 = vpop.f32.mrb[12].mxu1 }
 0x1b9   : > { %v713_v2 = vsel %vm698_vm2, %v664_v60, 0.0  ;;  %v535_v3 = vadd.f32 %v2717_v55, %v534_v63  ;;  %v1808_v4 = vpop.f32.mrb[13].mxu0  ;;  %763 = vst [vmem:[#allocation2 + $0xc8] sm:$0xff] %v684_v62  ;;  %v615_v5 = vadd.f32 %v2717_v55, %v614_v1  ;;  %v1848_v6 = vpop.f32.mrb[13].mxu1 }
 0x1ba   : > { %743 = vst [vmem:[#allocation2 + $0x28] sm:$0xff] %v713_v2  ;;  %v537_v7 = vpop.f32.mrb[14].mxu0  ;;  %v617_v8 = vpop.f32.mrb[14].mxu1 }
 0x1bb   : > { %v635_v9 = vmax.f32 %v535_v3, 0.0  ;;  %v538_v10 = vadd.f32 %v2717_v55, %v537_v7  ;;  %v1809_v11 = vpop.f32.mrb[15].mxu0  ;;  %v655_v12 = vmax.f32 %v615_v5, 0.0  ;;  %v618_v13 = vadd.f32 %v2717_v55, %v617_v8  ;;  %v1849_v14 = vpop.f32.mrb[15].mxu1 }
 0x1bd   : > { %v665_v15 = vmin.f32 %v635_v9, 6.0  ;;  %v636_v16 = vmax.f32 %v538_v10, 0.0  ;;  %v685_v17 = vmin.f32 %v655_v12, 6.0  ;;  %v656_v18 = vmax.f32 %v618_v13, 0.0 }
 0x1bf   : > { %v714_v19 = vsel %vm693_vm1, %v665_v15, 0.0  ;;  %v666_v20 = vmin.f32 %v636_v16, 6.0  ;;  %v734_v21 = vsel %vm698_vm2, %v685_v17, 0.0  ;;  %v686_v22 = vmin.f32 %v656_v18, 6.0 }
 0x1c0   : > { %744 = vst [vmem:[#allocation2 + $0x30] sm:$0xff] %v714_v19  ;;  %v542_v23 = vpop.f32.mrb[16].mxu0  ;;  %764 = vst [vmem:[#allocation2 + $0xd0] sm:$0xff] %v734_v21  ;;  %v622_v24 = vpop.f32.mrb[16].mxu1 }
 0x1c1   : > { %745 = vst [vmem:[#allocation2 + $0x38] sm:$0xff] %v666_v20  ;;  %v543_v25 = vadd.f32 %v2717_v55, %v542_v23  ;;  %v1812_v26 = vpop.f32.mrb[17].mxu0  ;;  %v735_v27 = vsel %vm693_vm1, %v686_v22, 0.0  ;;  %v623_v28 = vadd.f32 %v2717_v55, %v622_v24  ;;  %v1852_v29 = vpop.f32.mrb[17].mxu1 }
 0x1c2   : > { %v545_v30 = vpop.f32.mrb[18].mxu0  ;;  %765 = vst [vmem:[#allocation2 + $0xd8] sm:$0xff] %v735_v27  ;;  %v625_v31 = vpop.f32.mrb[18].mxu1 }
 0x1c3   : > { %v637_v32 = vmax.f32 %v543_v25, 0.0  ;;  %v546_v33 = vadd.f32 %v2717_v55, %v545_v30  ;;  %v1813_v34 = vpop.f32.mrb[19].mxu0  ;;  %v657_v35 = vmax.f32 %v623_v28, 0.0  ;;  %v626_v36 = vadd.f32 %v2717_v55, %v625_v31  ;;  %v1853_v37 = vpop.f32.mrb[19].mxu1 }
 0x1c5   : > { %v667_v38 = vmin.f32 %v637_v32, 6.0  ;;  %v638_v39 = vmax.f32 %v546_v33, 0.0  ;;  %v687_v40 = vmin.f32 %v657_v35, 6.0  ;;  %v658_v41 = vmax.f32 %v626_v36, 0.0 }
 0x1c7   : > { %v716_v42 = vsel %vm698_vm2, %v667_v38, 0.0  ;;  %v668_v43 = vmin.f32 %v638_v39, 6.0  ;;  %766 = vst [vmem:[#allocation2 + $0xe0] sm:$0xff] %v687_v40  ;;  %v688_v44 = vmin.f32 %v658_v41, 6.0 }
 0x1c8   : > { %746 = vst [vmem:[#allocation2 + $0x40] sm:$0xff] %v716_v42  ;;  %v550_v45 = vpop.f32.mrb[20].mxu0 }
 0x1c9   : > { %v717_v46 = vsel %vm693_vm1, %v668_v43, 0.0  ;;  %v551_v47 = vadd.f32 %v2717_v55, %v550_v45  ;;  %v1816_v48 = vpop.f32.mrb[21].mxu0  ;;  %v737_v49 = vsel %vm698_vm2, %v688_v44, 0.0 }
 0x1ca   : > { %747 = vst [vmem:[#allocation2 + $0x48] sm:$0xff] %v717_v46  ;;  %v553_v50 = vpop.f32.mrb[22].mxu0  ;;  %767 = vst [vmem:[#allocation2 + $0xe8] sm:$0xff] %v737_v49 }
 0x1cb   : > { %v639_v51 = vmax.f32 %v551_v47, 0.0  ;;  %v554_v52 = vadd.f32 %v2717_v55, %v553_v50  ;;  %v1817_v53 = vpop.f32.mrb[23].mxu0 }
 0x1cd   : > { %v669_v54 = vmin.f32 %v639_v51, 6.0  ;;  %v640_v56 = vmax.f32 %v554_v52, 0.0 }
 0x1cf   : > { %748 = vst [vmem:[#allocation2 + $0x50] sm:$0xff] %v669_v54  ;;  %v670_v58 = vmin.f32 %v640_v56, 6.0 }
 0x1d0   : > { %v558_v59 = vpop.f32.mrb[24].mxu0 }
 0x1d1   : > { %v719_v60 = vsel %vm698_vm2, %v670_v58, 0.0  ;;  %v559_v61 = vadd.f32 %v2717_v55, %v558_v59  ;;  %v1820_v62 = vpop.f32.mrb[25].mxu0 }
 0x1d2   : > { %749 = vst [vmem:[#allocation2 + $0x58] sm:$0xff] %v719_v60  ;;  %v561_v63 = vpop.f32.mrb[26].mxu0 }
 0x1d3   : > { %v641_v1 = vmax.f32 %v559_v61, 0.0  ;;  %v562_v2 = vadd.f32 %v2717_v55, %v561_v63  ;;  %v1821_v3 = vpop.f32.mrb[27].mxu0 }
 0x1d5   : > { %v671_v4 = vmin.f32 %v641_v1, 6.0  ;;  %v642_v5 = vmax.f32 %v562_v2, 0.0 }
 0x1d7   : > { %v720_v6 = vsel %vm693_vm1, %v671_v4, 0.0  ;;  %v672_v7 = vmin.f32 %v642_v5, 6.0 }
 0x1d8   : > { %750 = vst [vmem:[#allocation2 + $0x60] sm:$0xff] %v720_v6  ;;  %v566_v8 = vpop.f32.mrb[28].mxu0 }
 0x1d9   : > { %751 = vst [vmem:[#allocation2 + $0x68] sm:$0xff] %v672_v7  ;;  %v567_v9 = vadd.f32 %v2717_v55, %v566_v8  ;;  %v1824_v10 = vpop.f32.mrb[29].mxu0 }
 0x1da   : > { %v569_v11 = vpop.f32.mrb[30].mxu0 }
 0x1db   : > { %v643_v12 = vmax.f32 %v567_v9, 0.0  ;;  %v570_v13 = vadd.f32 %v2717_v55, %v569_v11  ;;  %v1825_v14 = vpop.f32.mrb[31].mxu0 }
 0x1dd   : > { %v673_v15 = vmin.f32 %v643_v12, 6.0  ;;  %v644_v16 = vmax.f32 %v570_v13, 0.0 }
 0x1df   : > { %v722_v17 = vsel %vm698_vm2, %v673_v15, 0.0  ;;  %v674_v18 = vmin.f32 %v644_v16, 6.0 }
 0x1e0   : > { %752 = vst [vmem:[#allocation2 + $0x70] sm:$0xff] %v722_v17  ;;  %v574_v19 = vpop.f32.mrb[32].mxu0 }
 0x1e1   : > { %v723_v20 = vsel %vm693_vm1, %v674_v18, 0.0  ;;  %v575_v21 = vadd.f32 %v2717_v55, %v574_v19  ;;  %v1828_v22 = vpop.f32.mrb[33].mxu0 }
 0x1e2   : > { %753 = vst [vmem:[#allocation2 + $0x78] sm:$0xff] %v723_v20  ;;  %v577_v23 = vpop.f32.mrb[34].mxu0 }
 0x1e3   : > { %v645_v24 = vmax.f32 %v575_v21, 0.0  ;;  %v578_v25 = vadd.f32 %v2717_v55, %v577_v23  ;;  %v1829_v26 = vpop.f32.mrb[35].mxu0 }
 0x1e5   : > { %v675_v27 = vmin.f32 %v645_v24, 6.0  ;;  %v646_v28 = vmax.f32 %v578_v25, 0.0 }
 0x1e7   : > { %754 = vst [vmem:[#allocation2 + $0x80] sm:$0xff] %v675_v27  ;;  %v676_v29 = vmin.f32 %v646_v28, 6.0 }
 0x1e8   : > { %v582_v30 = vpop.f32.mrb[36].mxu0 }
 0x1e9   : > { %v725_v31 = vsel %vm698_vm2, %v676_v29, 0.0  ;;  %v583_v32 = vadd.f32 %v2717_v55, %v582_v30  ;;  %v1832_v33 = vpop.f32.mrb[37].mxu0 }
 0x1ea   : > { %755 = vst [vmem:[#allocation2 + $0x88] sm:$0xff] %v725_v31  ;;  %v585_v34 = vpop.f32.mrb[38].mxu0 }
 0x1eb   : > { %v647_v35 = vmax.f32 %v583_v32, 0.0  ;;  %v586_v36 = vadd.f32 %v2717_v55, %v585_v34  ;;  %v1833_v37 = vpop.f32.mrb[39].mxu0  ;;  %771 = sbr.rel (%p1700_p4) target bundleno = 498 (0x1f2), region = 68 }
 0x1ed   : > { %v677_v38 = vmin.f32 %v647_v35, 6.0  ;;  %v648_v39 = vmax.f32 %v586_v36, 0.0 }
 0x1ef   : > { %v726_v40 = vsel %vm693_vm1, %v677_v38, 0.0  ;;  %v678_v41 = vmin.f32 %v648_v39, 6.0 }
 0x1f0   : > { %756 = vst [vmem:[#allocation2 + $0x90] sm:$0xff] %v726_v40 }
 0x1f1   : > { %757 = vst [vmem:[#allocation2 + $0x98] sm:$0xff] %v678_v41 }
 0x1f2 PF: > { %p1701_p3 = scmp.ne.s32.totalorder %s2292_s30, 1 }
 0x1f3   : > { %v2321_v55 = vmov (!%p1701_p3), 0.0  }
 0x1f4   : > { %778 = sbr.rel (%p1701_p3) target bundleno = 507 (0x1fb), region = 72  ;;  %780 = vst [vmem:[#allocation2 + $0xd8] sm:$0xff] (!%p1701_p3), %v2321_v55  ;;  %781 = vst [vmem:[#allocation2 + $0xe0] sm:$0xff] (!%p1701_p3), %v2321_v55 }
 0x1f5   : > { %782 = vst [vmem:[#allocation2 + $0xe8] sm:$0xff] (!%p1701_p3), %v2321_v55 }
 0x1fb PF: > { %v2056_v42 = vld [vmem:[#allocation9] sm:$0xff]   ;;  %v2057_v43 = vld [vmem:[#allocation9 + $0x8] sm:$0xff]   ;;  %v803_v44 = vsub.s32 0, %v2719_v57  ;;  %v855_v45 = vsub.s32 1, %v2719_v57  ;;  %v2058_v46 = vld [vmem:[#allocation9 + $0x10] sm:$0xff]   ;;  %v907_v47 = vsub.s32 2, %v2719_v57 }
 0x1fc   : > { %1854 = vmatprep.subr.bf16.mxu1 %v2056_v42  ;;  %v960_v48 = vsub.s32 3, %v2719_v57  ;;  %v1012_v49 = vsub.s32 4, %v2719_v57  ;;  %v1064_v50 = vsub.s32 5, %v2719_v57  ;;  %v1117_v51 = vsub.s32 6, %v2719_v57  ;;  %v2059_v53 = vld [vmem:[#allocation9 + $0x18] sm:$0xff]   ;;  %v783_v54 = vld [vmem:[#allocation8] sm:$0xff] }
 0x1fd   : > { %1855 = vmatpush3.bf16.msra.mxu1 %v2056_v42  ;;  %v1169_v52 = vsub.s32 7, %v2719_v57  ;;  %v785_v56 = vld [vmem:[#allocation2] sm:$0xff]  ;;  %v786_v58 = vld [vmem:[#allocation2 + $0x8] sm:$0xff]  ;;  %v2809_v59 = vrot.slane %v783_v54, %v803_v44  ;;  %v2811_v62 = vrot.slane %v783_v54, %v855_v45  ;;  %v2813_v63 = vrot.slane %v783_v54, %v907_v47  ;;  %v2825_v8 = vld [vmem:[#allocation8 + $0x8] ss:$0 sm:$0xff]  ;;  %s3320_s6 = sld [smem:[#allocation22_spill]] }
 0x1fe   : > { %1856 = vmatprep.subr.bf16.mxu1 %v2057_v43  ;;  %v837_v60 = vld [vmem:[#allocation2 + $0x1] sm:$0xff]  ;;  %v838_v61 = vld [vmem:[#allocation2 + $0x9] sm:$0xff]  ;;  %v2815_v1 = vrot.slane %v783_v54, %v960_v48  ;;  %v2817_v5 = vrot.slane %v783_v54, %v1012_v49  ;;  %v2819_v57 = vrot.slane %v783_v54, %v1064_v50  ;;  %v2821_v6 = vrot.slane %v783_v54, %v1117_v51  ;;  %v942_v13 = vld [vmem:[#allocation2 + $0x18] sm:$0xff]  ;;  %s3321_s3 = sld [smem:[#allocation24_spill]]  ;;  %s3322_s23 = sld [smem:[#allocation17_spill]] }
 0x1ff   : > { %v2060_v2 = vld [vmem:[#allocation9 + $0x20] sm:$0xff]   ;;  %v890_v4 = vld [vmem:[#allocation2 + $0xa] sm:$0xff]  ;;  %v2823_v7 = vrot.slane %v783_v54, %v1169_v52  ;;  %v805_v9 = vmul.f32 %v2809_v59, %v785_v56  ;;  %v806_v10 = vmul.f32 %v2809_v59, %v786_v58  ;;  %v857_v11 = vmul.f32 %v2811_v62, %v837_v60  ;;  %v2839_v28 = vld [vmem:[#allocation2 + $0x38] sm:$0xff]  ;;  %s1738_s15 = sshll.u32 %s2292_s30, 4  ;;  %s1554_s30 = sshll.u32 %s2797_s7, 4  ;;  %s3200_s30 = int_to_ptr.vmem [resolvable:$true] %s1554_s30 }
 0x200   : > { %v889_v3 = vld [vmem:[#allocation2 + $0x2] sm:$0xff]  ;;  %v858_v12 = vmul.f32 %v2811_v62, %v838_v61  ;;  %v910_v16 = vmul.f32 %v2813_v63, %v890_v4  ;;  %v962_v17 = vmul.f32 %v2815_v1, %v942_v13  ;;  %v994_v19 = vld [vmem:[#allocation2 + $0x19] sm:$0xff]  ;;  %v2837_v27 = vld [vmem:[#allocation2 + $0x30] sm:$0xff]  ;;  %v1120_v32 = vmul.f32 %v2821_v6, %v2839_v28  ;;  %s3323_s14 = sld [smem:[#allocation18_spill]]  ;;  %s3324_s13 = sld [smem:[#allocation25_spill]] }
 0x201   : > { %1857 = vmatpush3.bf16.msra.mxu1 %v2057_v43  ;;  %v943_v14 = vld [vmem:[#allocation2 + $0x20] sm:$0xff]  ;;  %v909_v15 = vmul.f32 %v2813_v63, %v889_v3  ;;  %v873_v22 = vadd.f32 %v857_v11, %v805_v9  ;;  %v1014_v24 = vmul.f32 %v2817_v5, %v994_v19  ;;  %v1119_v31 = vmul.f32 %v2821_v6, %v2837_v27  ;;  %v2847_v33 = vld [vmem:[#allocation2 + $0x31] sm:$0xff]  ;;  %v2061_v41 = vld [vmem:[#allocation9 + $0x28] sm:$0xff]   ;;  %s2322_s18 = smov [#allocation11]  }
 0x202   : > { %1858 = vmatprep.subr.bf16.mxu1 %v2058_v46  ;;  %v963_v18 = vmul.f32 %v2815_v1, %v943_v14  ;;  %v995_v20 = vld [vmem:[#allocation2 + $0x21] sm:$0xff]  ;;  %v874_v23 = vadd.f32 %v858_v12, %v806_v10  ;;  %v2849_v34 = vld [vmem:[#allocation2 + $0x39] sm:$0xff]  ;;  %v1171_v37 = vmul.f32 %v2823_v7, %v2847_v33  ;;  %v807_v42 = vmul.f32 %v942_v13, %v2809_v59  ;;  %v2062_v58 = vld [vmem:[#allocation9 + $0x30] sm:$0xff]   ;;  %s2182_s8 = sshll.u32 %s2322_s18, 4  ;;  %s2183_s8 = int_to_ptr.vmem [resolvable:$false] %s2182_s8 }
 0x203   : > { %v1046_v21 = vld [vmem:[#allocation2 + $0x1a] sm:$0xff]  ;;  %v1015_v25 = vmul.f32 %v2817_v5, %v995_v20  ;;  %v1047_v26 = vld [vmem:[#allocation2 + $0x22] sm:$0xff]  ;;  %v925_v35 = vadd.f32 %v909_v15, %v873_v22  ;;  %v1172_v38 = vmul.f32 %v2823_v7, %v2849_v34  ;;  %v1203_v39 = vld [vmem:[#allocation2 + $0x32] sm:$0xff]  ;;  %v808_v43 = vmul.f32 %v943_v14, %v2809_v59  ;;  %p2185_p0 = scmp.lt.s32.totalorder %s3200_s30, %s2183_s8 }
 0x204   : > { %v1066_v29 = vmul.f32 %v2819_v57, %v1046_v21  ;;  %v1067_v30 = vmul.f32 %v2819_v57, %v1047_v26  ;;  %v926_v36 = vadd.f32 %v910_v16, %v874_v23  ;;  %v1204_v40 = vld [vmem:[#allocation2 + $0x3a] sm:$0xff]  ;;  %v1223_v0 = vmul.f32 %v2825_v8, %v1203_v39  ;;  %v2873_v9 = vld [vmem:[#allocation2 + $0x48] sm:$0xff]  ;;  %v2875_v13 = vld [vmem:[#allocation2 + $0x50] sm:$0xff]  ;;  %s1734_s12 = sshll.u32 %s3322_s23, 5 }
 0x205   : > { %1859 = vmatpush3.bf16.msra.mxu1 %v2058_v46  ;;  %v1224_v55 = vmul.f32 %v2825_v8, %v1204_v40  ;;  %v978_v44 = vadd.f32 %v962_v17, %v925_v35  ;;  %v859_v46 = vmul.f32 %v994_v19, %v2811_v62  ;;  %v860_v47 = vmul.f32 %v995_v20, %v2811_v62  ;;  %v2877_v14 = vld [vmem:[#allocation2 + $0x49] sm:$0xff]  ;;  %v2879_v15 = vld [vmem:[#allocation2 + $0x51] sm:$0xff]  ;;  %s1551_s21 = sadd.s32 %s1738_s15, %s1734_s12 }
 0x206   : > { %1860 = vmatprep.subr.bf16.mxu1 %v2059_v53  ;;  %v979_v45 = vadd.f32 %v963_v18, %v926_v36  ;;  %v911_v48 = vmul.f32 %v1046_v21, %v2813_v63  ;;  %v912_v49 = vmul.f32 %v1047_v26, %v2813_v63  ;;  %v964_v50 = vmul.f32 %v2837_v27, %v2815_v1  ;;  %v2063_v26 = vld [vmem:[#allocation9 + $0x38] sm:$0xff]   ;;  %s1735_s19 = sshll.u32 %s1551_s21, 7  ;;  %p3325_p9 = scmp.ne.s32.totalorder %s3323_s14, 0 }
 0x207   : > { %v965_v51 = vmul.f32 %v2839_v28, %v2815_v1  ;;  %v1030_v52 = vadd.f32 %v1014_v24, %v978_v44  ;;  %v875_v54 = vadd.f32 %v859_v46, %v807_v42  ;;  %v876_v56 = vadd.f32 %v860_v47, %v808_v43  ;;  %v2889_v24 = vld [vmem:[#allocation2 + $0x4a] sm:$0xff]  ;;  %v2904_v43 = vld [vmem:[%s3320_s6] ss:$0 sm:$0xff]  ;;  %s3198_s27 = scalar_lea.hbm %s3324_s13, %s1735_s19  ;;  %s2178_s6 = scalar_lea.vmem %s3200_s30, 2048 }
 0x208   : > { %v1016_v60 = vmul.f32 %v2847_v33, %v2817_v5  ;;  %v1017_v61 = vmul.f32 %v2849_v34, %v2817_v5  ;;  %v1068_v3 = vmul.f32 %v1203_v39, %v2819_v57  ;;  %v1069_v4 = vmul.f32 %v1204_v40, %v2819_v57  ;;  %p2179_p7 = scmp.ne.s32.totalorder %s3200_s30, %s2178_s6 }
 0x209   : > { %1861 = vmatpush3.bf16.msra.mxu1 %v2059_v53  ;;  %v1031_v53 = vadd.f32 %v1015_v25, %v979_v45  ;;  %v1082_v10 = vadd.f32 %v1066_v29, %v1030_v52  ;;  %v927_v11 = vadd.f32 %v911_v48, %v875_v54  ;;  %v928_v12 = vadd.f32 %v912_v49, %v876_v56  ;;  %v2891_v25 = vld [vmem:[#allocation2 + $0x52] sm:$0xff] }
 0x20a   : > { %1862 = vmatprep.subr.bf16.mxu1 %v2060_v2  ;;  %v1121_v16 = vmul.f32 %v2821_v6, %v2873_v9  ;;  %v1122_v17 = vmul.f32 %v2821_v6, %v2875_v13  ;;  %v1173_v18 = vmul.f32 %v2823_v7, %v2877_v14  ;;  %v1174_v19 = vmul.f32 %v2823_v7, %v2879_v15  ;;  %p2180_p13 = pnand %p2179_p7, %p3325_p9 }
 0x20b   : > { %v1135_v20 = vadd.f32 %v1119_v31, %v1082_v10  ;;  %v980_v22 = vadd.f32 %v964_v50, %v927_v11  ;;  %v981_v23 = vadd.f32 %v965_v51, %v928_v12  ;;  %v1225_v29 = vmul.f32 %v2825_v8, %v2889_v24 }
 0x20c   : > { %v809_v35 = vmul.f32 %v2837_v27, %v2809_v59  ;;  %v810_v31 = vmul.f32 %v2839_v28, %v2809_v59  ;;  %v861_v44 = vmul.f32 %v2847_v33, %v2811_v62  ;;  %v862_v45 = vmul.f32 %v2849_v34, %v2811_v62  ;;  %p2181_p11 = pneg %p2180_p13 }
 0x20d   : > { %1863 = vmatpush3.bf16.msra.mxu1 %v2060_v2  ;;  %v1083_v2 = vadd.f32 %v1067_v30, %v1031_v53  ;;  %v1226_v30 = vmul.f32 %v2825_v8, %v2891_v25  ;;  %v1033_v42 = vadd.f32 %v1017_v61, %v981_v23  ;;  %v913_v27 = vmul.f32 %v1203_v39, %v2813_v63  ;;  %v2934_v23 = vld [vmem:[#allocation2 + $0x61] sm:$0xff] }
 0x20e   : > { %1864 = vmatprep.subr.bf16.mxu1 %v2061_v41  ;;  %v914_v46 = vmul.f32 %v1204_v40, %v2813_v63  ;;  %v877_v48 = vadd.f32 %v861_v44, %v809_v35  ;;  %v878_v49 = vadd.f32 %v862_v45, %v810_v31  ;;  %v966_v50 = vmul.f32 %v2873_v9, %v2815_v1  ;;  %v1208_v44 = vld [vmem:[#allocation2 + $0x6a] sm:$0xff] }
 0x20f   : > { %v1136_v21 = vadd.f32 %v1120_v32, %v1083_v2  ;;  %v1187_v32 = vadd.f32 %v1171_v37, %v1135_v20  ;;  %v1085_v47 = vadd.f32 %v1069_v4, %v1033_v42  ;;  %v967_v33 = vmul.f32 %v2875_v13, %v2815_v1  ;;  %v2928_v20 = vld [vmem:[#allocation2 + $0x68] sm:$0xff] }
 0x210   : > { %v929_v52 = vadd.f32 %v913_v27, %v877_v48  ;;  %v1019_v53 = vmul.f32 %v2879_v15, %v2817_v5  ;;  %v1070_v4 = vmul.f32 %v2889_v24, %v2819_v57  ;;  %v1071_v10 = vmul.f32 %v2891_v25, %v2819_v57 }
 0x211   : > { %1865 = vmatpush3.bf16.msra.mxu1 %v2061_v41  ;;  %v1188_v36 = vadd.f32 %v1172_v38, %v1136_v21  ;;  %v1032_v41 = vadd.f32 %v1016_v60, %v980_v22  ;;  %v1239_v28 = vadd.f32 %v1223_v0, %v1187_v32  ;;  %v1138_v40 = vadd.f32 %v1122_v17, %v1085_v47  ;;  %v2926_v17 = vld [vmem:[#allocation2 + $0x60] sm:$0xff] }
 0x212   : > { %1866 = vmatprep.subr.bf16.mxu1 %v2062_v58  ;;  %v930_v0 = vadd.f32 %v914_v46, %v878_v49  ;;  %v982_v61 = vadd.f32 %v966_v50, %v929_v52  ;;  %v1175_v31 = vmul.f32 %v2823_v7, %v2934_v23  ;;  %v2942_v32 = vld [vmem:[#allocation2 + $0x62] sm:$0xff]  ;;  %v812_v48 = vmul.f32 %v2875_v13, %v2809_v59 }
 0x213   : > { %v1240_v37 = vadd.f32 %v1224_v55, %v1188_v36  ;;  %v1084_v38 = vadd.f32 %v1068_v3, %v1032_v41  ;;  %v1262_v34 = vadd.f32 %v2904_v43, %v1239_v28  ;;  %v1018_v55 = vmul.f32 %v2877_v14, %v2817_v5 }
 0x214   : > { %v1190_v60 = vadd.f32 %v1174_v19, %v1138_v40  ;;  %v983_v3 = vadd.f32 %v967_v33, %v930_v0  ;;  %v1124_v19 = vmul.f32 %v2821_v6, %v2928_v20  ;;  %v1227_v45 = vmul.f32 %v2825_v8, %v2942_v32 }
 0x215   : > { %1867 = vmatpush3.bf16.msra.mxu1 %v2062_v58  ;;  %v1263_v39 = vadd.f32 %v2904_v43, %v1240_v37  ;;  %v1137_v51 = vadd.f32 %v1121_v16, %v1084_v38  ;;  %v1278_v54 = vmax.f32 %v1262_v34, 0.0  ;;  %v1034_v21 = vadd.f32 %v1018_v55, %v982_v61  ;;  %v2972_v61 = vld [vmem:[#allocation2 + $0x78] sm:$0xff] }
 0x216   : > { %1868 = vmatprep.subr.bf16.mxu1 %v2063_v26  ;;  %v1242_v16 = vadd.f32 %v1226_v30, %v1190_v60  ;;  %v1035_v22 = vadd.f32 %v1019_v53, %v983_v3  ;;  %v2938_v30 = vld [vmem:[#allocation2 + $0x69] sm:$0xff]  ;;  %v1228_v28 = vmul.f32 %v2825_v8, %v1208_v44  ;;  %v811_v37 = vmul.f32 %v2873_v9, %v2809_v59 }
 0x217   : > { %v1279_v56 = vmax.f32 %v1263_v39, 0.0  ;;  %v1189_v58 = vadd.f32 %v1173_v18, %v1137_v51  ;;  %v1294_v2 = vmin.f32 %v1278_v54, 6.0  ;;  %v1123_v18 = vmul.f32 %v2821_v6, %v2926_v17 }
 0x218   : > { %v1086_v36 = vadd.f32 %v1070_v4, %v1034_v21  ;;  %v1087_v41 = vadd.f32 %v1071_v10, %v1035_v22  ;;  %v1176_v42 = vmul.f32 %v2823_v7, %v2938_v30  ;;  %v863_v49 = vmul.f32 %v2877_v14, %v2811_v62 }
 0x219   : > { %1869 = vmatpush3.bf16.msra.mxu1 %v2063_v26  ;;  %v1295_v11 = vmin.f32 %v1279_v56, 6.0  ;;  %v1241_v12 = vadd.f32 %v1225_v29, %v1189_v58  ;;  %v1265_v29 = vadd.f32 %v2904_v43, %v1242_v16  ;;  %v864_v34 = vmul.f32 %v2879_v15, %v2811_v62  ;;  %v2980_v16 = vld [vmem:[#allocation2 + $0x81] sm:$0xff] }
 0x21a   : > { %v1139_v38 = vadd.f32 %v1123_v18, %v1086_v36  ;;  %v1140_v47 = vadd.f32 %v1124_v19, %v1087_v41  ;;  %v915_v39 = vmul.f32 %v2889_v24, %v2813_v63  ;;  %v879_v52 = vadd.f32 %v863_v49, %v811_v37  ;;  %v1210_v36 = vld [vmem:[#allocation2 + $0x82] sm:$0xff] }
 0x21b   : > { %v1310_v26 = vpack.c.bf16 %v1295_v11, %v1294_v2  ;;  %v1264_v35 = vadd.f32 %v2904_v43, %v1241_v12  ;;  %v1281_v46 = vmax.f32 %v1265_v29, 0.0  ;;  %v916_v9 = vmul.f32 %v2891_v25, %v2813_v63  ;;  %v2976_v2 = vld [vmem:[#allocation2 + $0x80] sm:$0xff] }
 0x21c   : > { %v1191_v51 = vadd.f32 %v1175_v31, %v1139_v38  ;;  %v1192_v40 = vadd.f32 %v1176_v42, %v1140_v47  ;;  %v880_v55 = vadd.f32 %v864_v34, %v812_v48  ;;  %v968_v13 = vmul.f32 %v2926_v17, %v2815_v1  ;;  %v1157_v12 = vld [vmem:[#allocation2 + $0x79] sm:$0xff] }
 0x21d   : > { %1870 = vmatprep.mubr.bf16.mxu1 %v1310_v26  ;;  %v1280_v27 = vmax.f32 %v1264_v35, 0.0  ;;  %v1297_v33 = vmin.f32 %v1281_v46, 6.0  ;;  %v969_v14 = vmul.f32 %v2928_v20, %v2815_v1  ;;  %v931_v15 = vadd.f32 %v915_v39, %v879_v52  ;;  %v1209_v26 = vld [vmem:[#allocation2 + $0x7a] sm:$0xff] }
 0x21e   : > { %v1243_v53 = vadd.f32 %v1227_v45, %v1191_v51  ;;  %v1244_v54 = vadd.f32 %v1228_v28, %v1192_v40  ;;  %v1020_v24 = vmul.f32 %v2934_v23, %v2817_v5  ;;  %v932_v56 = vadd.f32 %v916_v9, %v880_v55 }
 0x21f   : > { %v1296_v50 = vmin.f32 %v1280_v27, 6.0  ;;  %v1021_v58 = vmul.f32 %v2938_v30, %v2817_v5  ;;  %v1072_v25 = vmul.f32 %v2942_v32, %v2819_v57  ;;  %v1073_v60 = vmul.f32 %v1208_v44, %v2819_v57 }
 0x220   : > { %v1266_v3 = vadd.f32 %v2904_v43, %v1243_v53  ;;  %v1267_v4 = vadd.f32 %v2904_v43, %v1244_v54  ;;  %v984_v10 = vadd.f32 %v968_v13, %v931_v15  ;;  %v1125_v11 = vmul.f32 %v2821_v6, %v2972_v61  ;;  %v3011_v53 = vld [vmem:[#allocation2 + $0x98] sm:$0xff] }
 0x221   : > { %v1311_v0 = vpack.c.bf16 %v1297_v33, %v1296_v50  ;;  %v985_v21 = vadd.f32 %v969_v14, %v932_v56  ;;  %v1126_v22 = vmul.f32 %v2821_v6, %v2976_v2  ;;  %v1177_v18 = vmul.f32 %v2823_v7, %v1157_v12  ;;  %v3015_v15 = vld [vmem:[#allocation2 + $0x91] sm:$0xff] }
 0x222   : > { %v1178_v19 = vmul.f32 %v2823_v7, %v2980_v16  ;;  %v1282_v35 = vmax.f32 %v1266_v3, 0.0  ;;  %v1283_v29 = vmax.f32 %v1267_v4, 0.0  ;;  %v1036_v31 = vadd.f32 %v1020_v24, %v984_v10  ;;  %v3023_v3 = vld [vmem:[#allocation2 + $0x92] sm:$0xff] }
 0x223   : > { %1871 = vmatmul.mubr.bf16.vlgmr.msra.gmra.mrb[20].mxu1 %v1311_v0  ;;  %v1229_v41 = vmul.f32 %v2825_v8, %v1209_v26  ;;  %v1037_v42 = vadd.f32 %v1021_v58, %v985_v21  ;;  %v1230_v45 = vmul.f32 %v2825_v8, %v1210_v36  ;;  %v813_v27 = vmul.f32 %v2926_v17, %v2809_v59  ;;  %v3008_v0 = vld [vmem:[#allocation2 + $0x90] sm:$0xff]  ;;  %v3027_v21 = vld [vmem:[#allocation2 + $0x9a] sm:$0xff] }
 0x224   : > { %v814_v46 = vmul.f32 %v2928_v20, %v2809_v59  ;;  %v1298_v28 = vmin.f32 %v1282_v35, 6.0  ;;  %v1299_v37 = vmin.f32 %v1283_v29, 6.0  ;;  %v1088_v38 = vadd.f32 %v1072_v25, %v1036_v31  ;;  %v3019_v25 = vld [vmem:[#allocation2 + $0x99] sm:$0xff] }
 0x225   : > { %v865_v47 = vmul.f32 %v2934_v23, %v2811_v62  ;;  %v1089_v48 = vadd.f32 %v1073_v60, %v1037_v42  ;;  %v866_v49 = vmul.f32 %v2938_v30, %v2811_v62  ;;  %v917_v50 = vmul.f32 %v2942_v32, %v2813_v63 }
 0x226   : > { %v918_v33 = vmul.f32 %v1208_v44, %v2813_v63  ;;  %v1312_v34 = vpack.c.bf16 %v1299_v37, %v1298_v28  ;;  %v1141_v17 = vadd.f32 %v1125_v11, %v1088_v38  ;;  %v970_v20 = vmul.f32 %v2972_v61, %v2815_v1 }
 0x227   : > { %v881_v39 = vadd.f32 %v865_v47, %v813_v27  ;;  %v1142_v51 = vadd.f32 %v1126_v22, %v1089_v48  ;;  %v882_v40 = vadd.f32 %v866_v49, %v814_v46  ;;  %v971_v23 = vmul.f32 %v2976_v2, %v2815_v1 }
 0x228   : > { %v1022_v52 = vmul.f32 %v1157_v12, %v2817_v5  ;;  %1874 = vmatprep.mubr.bf16.mxu1 %v1312_v34  ;;  %v1193_v30 = vadd.f32 %v1177_v18, %v1141_v17  ;;  %v1023_v32 = vmul.f32 %v2980_v16, %v2817_v5  ;;  %v1074_v44 = vmul.f32 %v1209_v26, %v2819_v57 }
 0x229   : > { %v933_v9 = vadd.f32 %v917_v50, %v881_v39  ;;  %v1194_v55 = vadd.f32 %v1178_v19, %v1142_v51  ;;  %v934_v13 = vadd.f32 %v918_v33, %v882_v40  ;;  %v1075_v14 = vmul.f32 %v1210_v36, %v2819_v57 }
 0x22a   : > { %v1127_v54 = vmul.f32 %v2821_v6, %v3008_v0  ;;  %v1245_v24 = vadd.f32 %v1229_v41, %v1193_v30  ;;  %v1128_v58 = vmul.f32 %v2821_v6, %v3011_v53  ;;  %v1179_v60 = vmul.f32 %v2823_v7, %v3015_v15  ;;  %v3054_v30 = vld [vmem:[#allocation2 + $0xa8] sm:$0xff] }
 0x22b   : > { %v986_v56 = vadd.f32 %v970_v20, %v933_v9  ;;  %v1246_v4 = vadd.f32 %v1230_v45, %v1194_v55  ;;  %v987_v10 = vadd.f32 %v971_v23, %v934_v13  ;;  %v1180_v11 = vmul.f32 %v2823_v7, %v3019_v25  ;;  %v3058_v55 = vld [vmem:[#allocation2 + $0xb0] sm:$0xff] }
 0x22c   : > { %v1231_v22 = vmul.f32 %v2825_v8, %v3023_v3  ;;  %v1268_v18 = vadd.f32 %v2904_v43, %v1245_v24  ;;  %v1232_v35 = vmul.f32 %v2825_v8, %v3027_v21  ;;  %v815_v29 = vmul.f32 %v2972_v61, %v2809_v59 }
 0x22d   : > { %v1038_v19 = vadd.f32 %v1022_v52, %v986_v56  ;;  %v1269_v31 = vadd.f32 %v2904_v43, %v1246_v4  ;;  %v1039_v41 = vadd.f32 %v1023_v32, %v987_v10  ;;  %v816_v42 = vmul.f32 %v2976_v2, %v2809_v59  ;;  %v3070_v4 = vld [vmem:[#allocation2 + $0xaa] sm:$0xff] }
 0x22e   : > { %v867_v45 = vmul.f32 %v1157_v12, %v2811_v62  ;;  %v1284_v27 = vmax.f32 %v1268_v18, 0.0  ;;  %v868_v28 = vmul.f32 %v2980_v16, %v2811_v62  ;;  %v919_v37 = vmul.f32 %v1209_v26, %v2813_v63  ;;  %v3075_v18 = vld [vmem:[#allocation2 + $0xb2] sm:$0xff] }
 0x22f   : > { %v1090_v46 = vadd.f32 %v1074_v44, %v1038_v19  ;;  %v1285_v38 = vmax.f32 %v1269_v31, 0.0  ;;  %v1091_v47 = vadd.f32 %v1075_v14, %v1039_v41  ;;  %v920_v61 = vmul.f32 %v1210_v36, %v2813_v63  ;;  %v3062_v14 = vld [vmem:[#allocation2 + $0xa9] sm:$0xff] }
 0x230   : > { %v883_v48 = vadd.f32 %v867_v45, %v815_v29  ;;  %v1300_v49 = vmin.f32 %v1284_v27, 6.0  ;;  %v884_v33 = vadd.f32 %v868_v28, %v816_v42  ;;  %v972_v2 = vmul.f32 %v3008_v0, %v2815_v1 }
 0x231   : > { %v1143_v50 = vadd.f32 %v1127_v54, %v1090_v46  ;;  %v1301_v34 = vmin.f32 %v1285_v38, 6.0  ;;  %v1144_v12 = vadd.f32 %v1128_v58, %v1091_v47  ;;  %v973_v39 = vmul.f32 %v3011_v53, %v2815_v1  ;;  %v3066_v58 = vld [vmem:[#allocation2 + $0xb1] sm:$0xff] }
 0x232   : > { %v935_v17 = vadd.f32 %v919_v37, %v883_v48  ;;  %v936_v20 = vadd.f32 %v920_v61, %v884_v33  ;;  %v1024_v26 = vmul.f32 %v3015_v15, %v2817_v5  ;;  %v1025_v36 = vmul.f32 %v3019_v25, %v2817_v5 }
 0x233   : > { %v1195_v16 = vadd.f32 %v1179_v60, %v1143_v50  ;;  %v1313_v51 = vpack.c.bf16 %v1301_v34, %v1300_v49  ;;  %v1196_v40 = vadd.f32 %v1180_v11, %v1144_v12  ;;  %v1076_v52 = vmul.f32 %v3023_v3, %v2819_v57 }
 0x234   : > { %v988_v23 = vadd.f32 %v972_v2, %v935_v17  ;;  %v989_v32 = vadd.f32 %v973_v39, %v936_v20  ;;  %v1077_v44 = vmul.f32 %v3027_v21, %v2819_v57  ;;  %v1129_v13 = vmul.f32 %v2821_v6, %v3054_v30 }
 0x235   : > { %v1247_v9 = vadd.f32 %v1231_v22, %v1195_v16  ;;  %1875 = vmatmul.mubr.bf16.gmra.mrb[24].mxu1 %v1313_v51  ;;  %v1248_v54 = vadd.f32 %v1232_v35, %v1196_v40  ;;  %v1130_v56 = vmul.f32 %v2821_v6, %v3058_v55  ;;  %v1181_v60 = vmul.f32 %v2823_v7, %v3062_v14  ;;  %v1111_v51 = vld [vmem:[#allocation2 + $0xc0] sm:$0xff]  ;;  %v1112_v40 = vld [vmem:[#allocation2 + $0xc8] sm:$0xff] }
 0x236   : > { %v1040_v24 = vadd.f32 %v1024_v26, %v988_v23  ;;  %v1041_v11 = vadd.f32 %v1025_v36, %v989_v32  ;;  %v1182_v22 = vmul.f32 %v2823_v7, %v3066_v58  ;;  %v1233_v19 = vmul.f32 %v2825_v8, %v3070_v4 }
 0x237   : > { %v1270_v10 = vadd.f32 %v2904_v43, %v1247_v9  ;;  %v1271_v35 = vadd.f32 %v2904_v43, %v1248_v54  ;;  %v1234_v31 = vmul.f32 %v2825_v8, %v3075_v18  ;;  %v817_v41 = vmul.f32 %v3008_v0, %v2809_v59 }
 0x238   : > { %v1092_v29 = vadd.f32 %v1076_v52, %v1040_v24  ;;  %v1093_v45 = vadd.f32 %v1077_v44, %v1041_v11  ;;  %v818_v27 = vmul.f32 %v3011_v53, %v2809_v59  ;;  %v869_v46 = vmul.f32 %v3015_v15, %v2811_v62  ;;  %v1163_v44 = vld [vmem:[#allocation2 + $0xc1] sm:$0xff]  ;;  %v1216_v11 = vld [vmem:[#allocation2 + $0xca] sm:$0xff] }
 0x239   : > { %v1286_v42 = vmax.f32 %v1270_v10, 0.0  ;;  %v1287_v28 = vmax.f32 %v1271_v35, 0.0  ;;  %v870_v38 = vmul.f32 %v3019_v25, %v2811_v62  ;;  %v921_v47 = vmul.f32 %v3023_v3, %v2813_v63  ;;  %v1215_v10 = vld [vmem:[#allocation2 + $0xc2] sm:$0xff] }
 0x23a   : > { %v1145_v37 = vadd.f32 %v1129_v13, %v1092_v29  ;;  %v1146_v61 = vadd.f32 %v1130_v56, %v1093_v45  ;;  %v885_v49 = vadd.f32 %v869_v46, %v817_v41  ;;  %v922_v0 = vmul.f32 %v3027_v21, %v2813_v63  ;;  %v1164_v13 = vld [vmem:[#allocation2 + $0xc9] sm:$0xff] }
 0x23b   : > { %v1302_v48 = vmin.f32 %v1286_v42, 6.0  ;;  %v1303_v50 = vmin.f32 %v1287_v28, 6.0  ;;  %v886_v53 = vadd.f32 %v870_v38, %v818_v27  ;;  %v974_v15 = vmul.f32 %v3054_v30, %v2815_v1 }
 0x23c   : > { %v1197_v33 = vadd.f32 %v1181_v60, %v1145_v37  ;;  %v1198_v2 = vadd.f32 %v1182_v22, %v1146_v61  ;;  %v937_v34 = vadd.f32 %v921_v47, %v885_v49  ;;  %v975_v25 = vmul.f32 %v3058_v55, %v2815_v1 }
 0x23d   : > { %v1026_v3 = vmul.f32 %v3062_v14, %v2817_v5  ;;  %v1314_v12 = vpack.c.bf16 %v1303_v50, %v1302_v48  ;;  %v938_v39 = vadd.f32 %v922_v0, %v886_v53  ;;  %v1027_v21 = vmul.f32 %v3066_v58, %v2817_v5 }
 0x23e   : > { %v1249_v17 = vadd.f32 %v1233_v19, %v1197_v33  ;;  %v1250_v16 = vadd.f32 %v1234_v31, %v1198_v2  ;;  %v990_v20 = vadd.f32 %v974_v15, %v937_v34  ;;  %v1078_v26 = vmul.f32 %v3070_v4, %v2819_v57 }
 0x23f   : > { %v1079_v36 = vmul.f32 %v3075_v18, %v2819_v57  ;;  %1878 = vmatprep.mubr.bf16.mxu1 %v1314_v12  ;;  %v991_v52 = vadd.f32 %v975_v25, %v938_v39  ;;  %v1131_v9 = vmul.f32 %v2821_v6, %v1111_v51  ;;  %v1132_v32 = vmul.f32 %v2821_v6, %v1112_v40 }
 0x240   : > { %v1272_v23 = vadd.f32 %v2904_v43, %v1249_v17  ;;  %v1273_v54 = vadd.f32 %v2904_v43, %v1250_v16  ;;  %v1042_v24 = vadd.f32 %v1026_v3, %v990_v20  ;;  %v1183_v56 = vmul.f32 %v2823_v7, %v1163_v44  ;;  %v1165_v17 = vld [vmem:[#allocation2 + $0xd9] sm:$0xff] }
 0x241   : > { %v1184_v60 = vmul.f32 %v2823_v7, %v1164_v13  ;;  %v1043_v19 = vadd.f32 %v1027_v21, %v991_v52  ;;  %v1235_v35 = vmul.f32 %v2825_v8, %v1215_v10  ;;  %v1236_v29 = vmul.f32 %v2825_v8, %v1216_v11  ;;  %v1166_v21 = vld [vmem:[#allocation2 + $0xe1] sm:$0xff] }
 0x242   : > { %v1288_v22 = vmax.f32 %v1272_v23, 0.0  ;;  %v1289_v31 = vmax.f32 %v1273_v54, 0.0  ;;  %v1094_v41 = vadd.f32 %v1078_v26, %v1042_v24  ;;  %v819_v42 = vmul.f32 %v3054_v30, %v2809_v59  ;;  %v1218_v23 = vld [vmem:[#allocation2 + $0xe2] sm:$0xff] }
 0x243   : > { %v820_v45 = vmul.f32 %v3058_v55, %v2809_v59  ;;  %v1095_v46 = vadd.f32 %v1079_v36, %v1043_v19  ;;  %v871_v28 = vmul.f32 %v3062_v14, %v2811_v62  ;;  %v872_v37 = vmul.f32 %v3066_v58, %v2811_v62  ;;  %v1217_v36 = vld [vmem:[#allocation2 + $0xda] sm:$0xff] }
 0x244   : > { %v1304_v27 = vmin.f32 %v1288_v22, 6.0  ;;  %v1305_v38 = vmin.f32 %v1289_v31, 6.0  ;;  %v1147_v47 = vadd.f32 %v1131_v9, %v1094_v41  ;;  %v923_v48 = vmul.f32 %v3070_v4, %v2813_v63  ;;  %v1113_v4 = vld [vmem:[#allocation2 + $0xd8] sm:$0xff] }
 0x245   : > { %v924_v61 = vmul.f32 %v3075_v18, %v2813_v63  ;;  %v1148_v30 = vadd.f32 %v1132_v32, %v1095_v46  ;;  %v887_v49 = vadd.f32 %v871_v28, %v819_v42  ;;  %v888_v0 = vadd.f32 %v872_v37, %v820_v45  ;;  %v1114_v18 = vld [vmem:[#allocation2 + $0xe0] sm:$0xff]  ;;  %v1717_v46 = vld [vmem:[%s2652_s16 + $0x31] sm:$0xff] }
 0x246   : > { %v976_v59 = vmul.f32 %v1111_v51, %v2815_v1  ;;  %v1315_v55 = vpack.c.bf16 %v1305_v38, %v1304_v27  ;;  %v1199_v50 = vadd.f32 %v1183_v56, %v1147_v47  ;;  %v977_v14 = vmul.f32 %v1112_v40, %v2815_v1  ;;  %v1715_v37 = vld [vmem:[%s2652_s16 + $0x19] sm:$0xff] }
 0x247   : > { %v1028_v33 = vmul.f32 %v1163_v44, %v2817_v5  ;;  %v1200_v62 = vadd.f32 %v1184_v60, %v1148_v30  ;;  %v939_v58 = vadd.f32 %v923_v48, %v887_v49  ;;  %v940_v53 = vadd.f32 %v924_v61, %v888_v0  ;;  %v1718_v48 = vld [vmem:[%s2652_s16 + $0x39] sm:$0xff]  ;;  %v1716_v0 = vld [vmem:[%s2652_s16 + $0x21] sm:$0xff] }
 0x248   : > { %v1029_v15 = vmul.f32 %v1164_v13, %v2817_v5  ;;  %1879 = vmatmul.mubr.bf16.gmra.mrb[28].mxu1 %v1315_v55  ;;  %v1251_v2 = vadd.f32 %v1235_v35, %v1199_v50  ;;  %v1080_v63 = vmul.f32 %v1215_v10, %v2819_v57  ;;  %v1081_v12 = vmul.f32 %v1216_v11, %v2819_v57 }
 0x249   : > { %v1252_v34 = vadd.f32 %v1236_v29, %v1200_v62  ;;  %v992_v25 = vadd.f32 %v976_v59, %v939_v58  ;;  %v993_v3 = vadd.f32 %v977_v14, %v940_v53  ;;  %v1133_v39 = vmul.f32 %v2821_v6, %v1113_v4  ;;  %v1721_v62 = vld [vmem:[%s2652_s16 + $0x61] sm:$0xff] }
 0x24a   : > { %v1274_v1 = vadd.f32 %v2904_v43, %v1251_v2  ;;  %v1134_v26 = vmul.f32 %v2821_v6, %v1114_v18  ;;  %v1185_v40 = vmul.f32 %v2823_v7, %v1165_v17  ;;  %v1186_v32 = vmul.f32 %v2823_v7, %v1166_v21 }
 0x24b   : > { %v1275_v16 = vadd.f32 %v2904_v43, %v1252_v34  ;;  %v1044_v5 = vadd.f32 %v1028_v33, %v992_v25  ;;  %v1045_v20 = vadd.f32 %v1029_v15, %v993_v3  ;;  %v1237_v13 = vmul.f32 %v2825_v8, %v1217_v36  ;;  %v1719_v15 = vld [vmem:[%s2652_s16 + $0x49] sm:$0xff]  ;;  %v1720_v3 = vld [vmem:[%s2652_s16 + $0x51] sm:$0xff] }
 0x24c   : > { %v1290_v51 = vmax.f32 %v1274_v1, 0.0  ;;  %v1238_v60 = vmul.f32 %v2825_v8, %v1218_v23  ;;  %v3145_v8 = vld [vmem:[%s3321_s3] ss:$0 sm:$0xff]  ;;  %s2184_s3 = scalar_lea.vmem %s2183_s8, 4096 }
 0x24d   : > { %v1291_v52 = vmax.f32 %v1275_v16, 0.0  ;;  %v1096_v9 = vadd.f32 %v1080_v63, %v1044_v5  ;;  %v1097_v57 = vadd.f32 %v1081_v12, %v1045_v20  ;;  %v1722_v63 = vld [vmem:[%s2652_s16 + $0x69] sm:$0xff]  ;;  %v1725_v16 = vld [vmem:[%s2652_s16 + $0x91] sm:$0xff]  ;;  %p2186_p5 = scmp.lt.s32.totalorder %s2184_s3, %s2178_s6 }
 0x24e   : > { %v1306_v44 = vmin.f32 %v1290_v51, 6.0 }
 0x24f   : > { %v1307_v54 = vmin.f32 %v1291_v52, 6.0  ;;  %v1149_v24 = vadd.f32 %v1133_v39, %v1096_v9  ;;  %v1150_v56 = vadd.f32 %v1134_v26, %v1097_v57  ;;  %v1723_v26 = vld [vmem:[%s2652_s16 + $0x79] sm:$0xff]  ;;  %v1724_v57 = vld [vmem:[%s2652_s16 + $0x81] sm:$0xff]  ;;  %p2187_p8 = por %p2186_p5, %p2185_p0 }
 0x251   : > { %v1316_v10 = vpack.c.bf16 %v1307_v54, %v1306_v44  ;;  %v1201_v6 = vadd.f32 %v1185_v40, %v1149_v24  ;;  %v1202_v11 = vadd.f32 %v1186_v32, %v1150_v56  ;;  %v1726_v40 = vld [vmem:[%s2652_s16 + $0x99] sm:$0xff]  ;;  %v1729_v56 = vld [vmem:[%s2652_s16 + $0xc1] sm:$0xff]  ;;  %p2188_p12 = pnand %p2187_p8, %p2181_p11 }
 0x253   : > { %1882 = vmatprep.mubr.bf16.mxu1 %v1316_v10  ;;  %v1253_v22 = vadd.f32 %v1237_v13, %v1201_v6  ;;  %v1254_v19 = vadd.f32 %v1238_v60, %v1202_v11  ;;  %v1727_v6 = vld [vmem:[%s2652_s16 + $0xa9] sm:$0xff] }
 0x255   : > { %v1276_v35 = vadd.f32 %v2904_v43, %v1253_v22  ;;  %v1277_v7 = vadd.f32 %v2904_v43, %v1254_v19  ;;  %v1730_v19 = vld [vmem:[%s2652_s16 + $0xc9] sm:$0xff] }
 0x257   : > { %v1292_v29 = vmax.f32 %v1276_v35, 0.0  ;;  %v1293_v31 = vmax.f32 %v1277_v7, 0.0 }
 0x259   : > { %v1308_v41 = vmin.f32 %v1292_v29, 6.0  ;;  %v1309_v42 = vmin.f32 %v1293_v31, 6.0  ;;  %v1728_v31 = vld [vmem:[%s2652_s16 + $0xb1] sm:$0xff]  ;;  %s3207_s16 = scalar_lea.sflag [#allocation5], %s352_s5 }
 0x25b   : > { %v1317_v45 = vpack.c.bf16 %v1309_v42, %v1308_v41 }
 0x25d   : > { %1883 = vmatmul.mubr.bf16.gmra.mrb[32].mxu1 %v1317_v45 }
 0x2f6   : > { %v1872_v27 = vpop.f32.mrb[20].mxu1 }
 0x2f7   : > { %v1432_v28 = vadd.f32 %v1872_v27, %v3145_v8  ;;  %v1423_v43 = vpop.f32.mrb[21].mxu1 }
 0x2f8   : > { %v1424_v38 = vadd.f32 %v3145_v8, %v1423_v43  ;;  %v1873_v47 = vpop.f32.mrb[22].mxu1 }
 0x2f9   : > { %v1507_v61 = vadd.f32 %v1717_v46, %v1432_v28  ;;  %v1435_v30 = vadd.f32 %v1873_v47, %v3145_v8  ;;  %v1426_v49 = vpop.f32.mrb[23].mxu1 }
 0x2fa   : > { %v1505_v59 = vadd.f32 %v1715_v37, %v1424_v38  ;;  %v1427_v55 = vadd.f32 %v3145_v8, %v1426_v49 }
 0x2fb   : > { %1523 = vst [vmem:[%s2797_s7 + $0x10] sm:$0xff] %v1507_v61  ;;  %v1508_v50 = vadd.f32 %v1718_v48, %v1435_v30 }
 0x2fc   : > { %1521 = vst [vmem:[%s2797_s7] sm:$0xff] %v1505_v59  ;;  %v1506_v14 = vadd.f32 %v1716_v0, %v1427_v55 }
 0x2fd   : > { %1524 = vst [vmem:[%s2797_s7 + $0x18] sm:$0xff] %v1508_v50 }
 0x2fe   : > { %1522 = vst [vmem:[%s2797_s7 + $0x8] sm:$0xff] %v1506_v14 }
 0x308   : > { %v1876_v33 = vpop.f32.mrb[24].mxu1 }
 0x309   : > { %v1448_v58 = vadd.f32 %v1876_v33, %v3145_v8  ;;  %v1439_v53 = vpop.f32.mrb[25].mxu1 }
 0x30a   : > { %v1440_v4 = vadd.f32 %v3145_v8, %v1439_v53  ;;  %v1877_v2 = vpop.f32.mrb[26].mxu1 }
 0x30b   : > { %v1511_v18 = vadd.f32 %v1721_v62, %v1448_v58  ;;  %v1451_v34 = vadd.f32 %v1877_v2, %v3145_v8  ;;  %v1442_v25 = vpop.f32.mrb[27].mxu1 }
 0x30c   : > { %v1509_v12 = vadd.f32 %v1719_v15, %v1440_v4  ;;  %v1443_v17 = vadd.f32 %v3145_v8, %v1442_v25 }
 0x30d   : > { %1527 = vst [vmem:[%s2797_s7 + $0x30] sm:$0xff] %v1511_v18  ;;  %v1512_v1 = vadd.f32 %v1722_v63, %v1451_v34 }
 0x30e   : > { %1525 = vst [vmem:[%s2797_s7 + $0x20] sm:$0xff] %v1509_v12  ;;  %v1510_v39 = vadd.f32 %v1720_v3, %v1443_v17 }
 0x30f   : > { %1528 = vst [vmem:[%s2797_s7 + $0x38] sm:$0xff] %v1512_v1 }
 0x310   : > { %1526 = vst [vmem:[%s2797_s7 + $0x28] sm:$0xff] %v1510_v39 }
 0x31b   : > { %v1880_v21 = vpop.f32.mrb[28].mxu1 }
 0x31c   : > { %v1464_v5 = vadd.f32 %v1880_v21, %v3145_v8  ;;  %v1455_v20 = vpop.f32.mrb[29].mxu1 }
 0x31d   : > { %v1456_v36 = vadd.f32 %v3145_v8, %v1455_v20  ;;  %v1881_v51 = vpop.f32.mrb[30].mxu1 }
 0x31e   : > { %v1515_v23 = vadd.f32 %v1725_v16, %v1464_v5  ;;  %v1467_v52 = vadd.f32 %v1881_v51, %v3145_v8  ;;  %v1458_v9 = vpop.f32.mrb[31].mxu1 }
 0x31f   : > { %v1513_v32 = vadd.f32 %v1723_v26, %v1456_v36  ;;  %v1459_v44 = vadd.f32 %v3145_v8, %v1458_v9 }
 0x320   : > { %1531 = vst [vmem:[%s2797_s7 + $0x50] sm:$0xff] %v1515_v23  ;;  %v1516_v13 = vadd.f32 %v1726_v40, %v1467_v52 }
 0x321   : > { %1529 = vst [vmem:[%s2797_s7 + $0x40] sm:$0xff] %v1513_v32  ;;  %v1514_v54 = vadd.f32 %v1724_v57, %v1459_v44 }
 0x322   : > { %1532 = vst [vmem:[%s2797_s7 + $0x58] sm:$0xff] %v1516_v13 }
 0x323   : > { %1530 = vst [vmem:[%s2797_s7 + $0x48] sm:$0xff] %v1514_v54 }
 0x330   : > { %v1884_v24 = vpop.f32.mrb[32].mxu1 }
 0x331   : > { %v1480_v60 = vadd.f32 %v1884_v24, %v3145_v8  ;;  %v1471_v10 = vpop.f32.mrb[33].mxu1 }
 0x332   : > { %v1472_v11 = vadd.f32 %v3145_v8, %v1471_v10  ;;  %v1885_v22 = vpop.f32.mrb[34].mxu1 }
 0x333   : > { %v1519_v35 = vadd.f32 %v1729_v56, %v1480_v60  ;;  %v1483_v7 = vadd.f32 %v1885_v22, %v3145_v8  ;;  %v1474_v29 = vpop.f32.mrb[35].mxu1 }
 0x334   : > { %v1517_v41 = vadd.f32 %v1727_v6, %v1472_v11  ;;  %v1475_v42 = vadd.f32 %v3145_v8, %v1474_v29 }
 0x335   : > { %1535 = vst [vmem:[%s2797_s7 + $0x70] sm:$0xff] %v1519_v35  ;;  %v1520_v45 = vadd.f32 %v1730_v19, %v1483_v7 }
 0x336   : > { %1533 = vst [vmem:[%s2797_s7 + $0x60] sm:$0xff] %v1517_v41  ;;  %v1518_v27 = vadd.f32 %v1728_v31, %v1475_v42 }
 0x337   : > { %1536 = vst [vmem:[%s2797_s7 + $0x78] sm:$0xff] %v1520_v45 }
 0x338   : > { %1534 = vst [vmem:[%s2797_s7 + $0x68] sm:$0xff] %v1518_v27 }
 0x339   : > { %2191 = shalt.err (!%p2188_p12)
}
 0x33a   : > { %s2192_s5 = scalar_lea.hbm %s3198_s27, 2048  ;;  %s2196_s15 = scalar_lea.hbm %s3324_s13, 8192 }
 0x33b   : > { %p2193_p2 = scmp.ne.s32.totalorder %s3198_s27, %s2192_s5  ;;  %p2197_p1 = scmp.lt.u32.totalorder %s3198_s27, %s3324_s13 }
 0x33c   : > { %p2198_p4 = scmp.lt.u32.totalorder %s2196_s15, %s2192_s5  ;;  %p2200_p7 = scmp.lt.u32.totalorder %s2192_s5, %s3198_s27 }
 0x33d   : > { %p2194_p6 = pnand %p2193_p2, %p3325_p9 }
 0x33e   : > { %p2199_p3 = por %p2198_p4, %p2197_p1 }
 0x33f   : > { %p2195_p10 = pneg %p2194_p6 }
 0x340   : > { %p2201_p13 = por %p2200_p7, %p2199_p3 }
 0x342   : > { %p2202_p11 = pnand %p2201_p13, %p2195_p10 }
 0x344   : > { %2205 = shalt.err (!%p2202_p11)
}
 0x345   : > { %s2323_s19 = smov 128   ;;  %s2324_s4 = smov 8  }
 0x346   : > { %1919 = dma.vmem_to_hbm [thread:$0]  (%p3325_p9), %s3200_s30, 2048, %s3198_s27, %s3207_s16, %s2323_s19, %s2323_s19, %s2324_s4  }
 0x347 PF: > { %s3326_s17 = sld [smem:[#allocation16_spill]]  ;;  %s3327_s6 = sld [smem:[#allocation19_spill]] }
 0x348   : > { %p1946_p0 = scmp.ge.s32.totalorder %s2308_s11, 2 }
 0x34d   : > { %s1569_s18 = sand.u32 1, %s3326_s17   ;;  %p3328_p5 = scmp.ne.s32.totalorder %s3327_s6, 0 }
 0x34e   : > { %s1570_s8 = scalar_lea.sflag [#allocation5], %s1569_s18 }
 0x34f   : > { %p1936_p8 = pnand %p1946_p0, %p3328_p5 }
 0x351   : > { %2263 = dma.done.wait (!%p1936_p8), %s1570_s8, 2048  }
 0x352   : > { %2265 = vsyncadd (!%p1936_p8), %s1570_s8, 4294965248  ;;  %s25_s11 = sadd.s32 1, %s2308_s11   ;;  %s3329_s30 = smov %s2557_s24 }
 0x353   : > { %p22_p12 = scmp.ge.s32.totalorder %s25_s11, 6   ;;  %s3330_s24 = smov %s2272_s25 }
 0x354   : > { %s3331_s25 = smov %s2276_s26  ;;  %s3332_s26 = smov %s2562_s1 }
 0x355   : > { %s3333_s27 = smov %s2284_s28  ;;  %s3334_s28 = smov %s2288_s29 }
 0x356   : > { %s3335_s29 = smov %s3329_s30  ;;  %s3336_s30 = smov %s2300_s9 }
 0x357   : > { %s3337_s8 = smov %s2304_s10  ;;  %s3338_s9 = smov %s3341_s20 }
 0x358   : > { %s3339_s10 = smov %s3345_s22  ;;  %24 = sbr.rel (!%p22_p12) target bundleno = 18 (0x12), region = 118 }
 0x35f   :  { %1575 = vsyncpa [#allocation4], 1 }
 0x360   :  { %1577 = vsyncpa [#allocation4 + $0x1], 1 }
 0x361   :  { %1578 = vsyncpa [#allocation7], 1 }
 0x362   :  { %1579 = vsyncpa [#allocation10], 1 }
 0x363   :  { %1580 = vsyncpa [#allocation5], 1 }
 0x364   :  { %1582 = vsyncpa [#allocation5 + $0x1], 1 }

</bundles_post_ra>
